<compile_context>
chip_gen: v6e
topology: v6e:2x2x1
jax: 0.10.0
libtpu: 0.0.40
codegen_flags: <defaults>
</compile_context>

<pallas_src>
import functools

import jax
import jax.numpy as jnp
from jax.experimental import pallas as pl
from jax.experimental.pallas import tpu as pltpu


# ---------------------------------------------------------------------------
# In-kernel helpers (traced inside the Pallas kernel body)
# ---------------------------------------------------------------------------
def _layer_norm(x, gamma, beta, eps=1e-5):
    mu = jnp.mean(x, axis=-1, keepdims=True)
    var = jnp.mean(jnp.square(x - mu), axis=-1, keepdims=True)
    return (x - mu) * jax.lax.rsqrt(var + eps) * gamma + beta


def _mha_core(q, k, v, wo, bo, bias, *, num_heads, cd):
    """Multi-head attention after the Q/K/V projections.

    q: (T, D) f32 (already scaled by 1/sqrt(dk)), k/v: (S, D) f32,
    wo: (D, D) compute-dtype, bo: (1, D) f32,
    bias: (T, S) additive mask bias (0 = keep, -1e9 = masked).
    """
    f32 = jnp.float32
    T, D = q.shape
    H = num_heads
    dk = D // H

    # Split heads via static lane slices -> (H, T, dk) / (H, S, dk).
    qh = jnp.stack([q[:, h * dk:(h + 1) * dk] for h in range(H)], axis=0)
    kh = jnp.stack([k[:, h * dk:(h + 1) * dk] for h in range(H)], axis=0)
    vh = jnp.stack([v[:, h * dk:(h + 1) * dk] for h in range(H)], axis=0)

    # One head-batched contraction (no explicit transpose of k), one softmax,
    # additive mask bias applied once (broadcast over heads).
    s = jnp.einsum("htd,hsd->hts", qh.astype(cd), kh.astype(cd),
                   preferred_element_type=f32)              # (H, T, S)
    s = s + bias
    m = jnp.max(s, axis=-1, keepdims=True)
    p = jnp.exp(s - m)
    denom = jnp.sum(p, axis=-1, keepdims=True)
    p = p * pl.reciprocal(denom, approx=True)               # EUP slot

    o = jnp.einsum("hts,hsd->htd", p.astype(cd), vh.astype(cd),
                   preferred_element_type=f32)              # (H, T, dk)

    # concat heads and a single output-projection matmul
    heads = jnp.concatenate([o[h] for h in range(H)], axis=-1)   # (T, D)
    return jnp.dot(heads.astype(cd), wo, preferred_element_type=f32) + bo


# ---------------------------------------------------------------------------
# Pallas kernel: one grid step == one batch element, full decoder layer.
# ---------------------------------------------------------------------------
def decoder_layer_kernel(
    # data (per-batch blocks)
    tgt_ref, mem_ref, tmask_ref, mmask_ref,
    # self-attn params (packed)
    sa_wqkv_ref, sa_bqkv_ref, sa_wo_ref, sa_bo_ref,
    # cross-attn params
    ca_wq_ref, ca_bq_ref, ca_wkv_ref, ca_bkv_ref, ca_wo_ref, ca_bo_ref,
    # FFN params
    ff_w1_ref, ff_b1_ref, ff_w2_ref, ff_b2_ref,
    # LayerNorm params (packed: rows 0/1/2 = norm1/norm2/norm3)
    ln_g_ref, ln_b_ref,
    # output
    out_ref,
    *, num_heads, compute_dtype,
):
    f32 = jnp.float32
    cd = compute_dtype

    x = tgt_ref[0].astype(f32)       # (T, D)
    mem = mem_ref[0].astype(f32)     # (S, D)
    D = x.shape[-1]
    dk = D // num_heads
    scale = 1.0 / (dk ** 0.5)

    ln_g = ln_g_ref[...]             # (3, D)
    ln_b = ln_b_ref[...]             # (3, D)

    # masks -> additive bias, computed once per attention (not per head)
    tbias = jnp.where(tmask_ref[0] > 0, 0.0, -1e9).astype(f32)   # (T, T)
    mbias = jnp.where(mmask_ref[0] > 0, 0.0, -1e9).astype(f32)   # (T, S)

    # --- masked self-attention + residual + LayerNorm (dropout = identity) ---
    qkv = (jnp.dot(x.astype(cd), sa_wqkv_ref[...], preferred_element_type=f32)
           + sa_bqkv_ref[...])                                    # (T, 3D)
    sa = _mha_core(qkv[:, :D] * scale, qkv[:, D:2 * D], qkv[:, 2 * D:],
                   sa_wo_ref[...], sa_bo_ref[...], tbias,
                   num_heads=num_heads, cd=cd)
    x = _layer_norm(x + sa, ln_g[0:1], ln_b[0:1])

    # --- cross-attention + residual + LayerNorm ---
    q = (jnp.dot(x.astype(cd), ca_wq_ref[...], preferred_element_type=f32)
         + ca_bq_ref[...]) * scale
    kv = (jnp.dot(mem.astype(cd), ca_wkv_ref[...], preferred_element_type=f32)
          + ca_bkv_ref[...])                                      # (S, 2D)
    ca = _mha_core(q, kv[:, :D], kv[:, D:],
                   ca_wo_ref[...], ca_bo_ref[...], mbias,
                   num_heads=num_heads, cd=cd)
    x = _layer_norm(x + ca, ln_g[1:2], ln_b[1:2])

    # --- positionwise feed-forward + residual + LayerNorm ---
    h = jnp.maximum(
        jnp.dot(x.astype(cd), ff_w1_ref[...], preferred_element_type=f32)
        + ff_b1_ref[...], 0.0)
    ff = (jnp.dot(h.astype(cd), ff_w2_ref[...], preferred_element_type=f32)
          + ff_b2_ref[...])
    x = _layer_norm(x + ff, ln_g[2:3], ln_b[2:3])

    out_ref[0] = x.astype(out_ref.dtype)


# ---------------------------------------------------------------------------
# Wrapper
# ---------------------------------------------------------------------------
def decoder_layer(tgt, memory, params, tgt_mask, memory_mask, num_heads,
                  compute_dtype=jnp.float32):
    """tgt: (T, B, D), memory: (S, B, D); masks: (B,1,T,T) / (B,1,T,S).
    Returns (T, B, D) float32.  `compute_dtype` controls matmul operand dtype
    (use jnp.bfloat16 on v6e/v7x); accumulation, softmax and LayerNorm stay f32.
    """
    T, B, D = tgt.shape
    S = memory.shape[0]

    (sa_wq, sa_bq, sa_wk, sa_bk, sa_wv, sa_bv, sa_wo, sa_bo,
     ca_wq, ca_bq, ca_wk, ca_bk, ca_wv, ca_bv, ca_wo, ca_bo,
     ff_w1, ff_b1, ff_w2, ff_b2,
     ln1_g, ln1_b, ln2_g, ln2_b, ln3_g, ln3_b) = params

    cd = compute_dtype
    # One-time parameter packing (in a real model these would be stored fused):
    sa_wqkv = jnp.concatenate([sa_wq, sa_wk, sa_wv], axis=1).astype(cd)  # (D,3D)
    sa_bqkv = jnp.concatenate([sa_bq, sa_bk, sa_bv], axis=1)             # (1,3D)
    ca_wkv = jnp.concatenate([ca_wk, ca_wv], axis=1).astype(cd)          # (D,2D)
    ca_bkv = jnp.concatenate([ca_bk, ca_bv], axis=1)                     # (1,2D)
    ln_g = jnp.concatenate([ln1_g, ln2_g, ln3_g], axis=0)                # (3,D)
    ln_b = jnp.concatenate([ln1_b, ln2_b, ln3_b], axis=0)

    # Batch-major activations / masks so each grid step's block has its last
    # two dims equal to the full array dims (safe TPU blocking).
    tgt_bm = jnp.transpose(tgt, (1, 0, 2))        # (B, T, D)
    mem_bm = jnp.transpose(memory, (1, 0, 2))     # (B, S, D)
    tmask = tgt_mask.reshape(B, T, T)
    mmask = memory_mask.reshape(B, T, S)

    kernel = functools.partial(decoder_layer_kernel,
                               num_heads=num_heads, compute_dtype=cd)

    def full(shape):
        # whole-array block, constant index_map -> DMA'd once, kept resident
        return pl.BlockSpec(shape, lambda b, _n=len(shape): (0,) * _n)

    out_bm = pl.pallas_call(
        kernel,
        grid=(B,),
        in_specs=[
            pl.BlockSpec((1, T, D), lambda b: (b, 0, 0)),   # tgt
            pl.BlockSpec((1, S, D), lambda b: (b, 0, 0)),   # memory
            pl.BlockSpec((1, T, T), lambda b: (b, 0, 0)),   # tgt_mask
            pl.BlockSpec((1, T, S), lambda b: (b, 0, 0)),   # memory_mask
            full((D, 3 * D)), full((1, 3 * D)), full((D, D)), full((1, D)),
            full((D, D)), full((1, D)), full((D, 2 * D)), full((1, 2 * D)),
            full((D, D)), full((1, D)),
            full(ff_w1.shape), full(ff_b1.shape),
            full(ff_w2.shape), full(ff_b2.shape),
            full((3, D)), full((3, D)),
        ],
        out_specs=pl.BlockSpec((1, T, D), lambda b: (b, 0, 0)),
        out_shape=jax.ShapeDtypeStruct((B, T, D), jnp.float32),
        compiler_params=pltpu.CompilerParams(
            dimension_semantics=("parallel",)),
    )(tgt_bm, mem_bm, tmask, mmask,
      sa_wqkv, sa_bqkv, sa_wo.astype(cd), sa_bo,
      ca_wq.astype(cd), ca_bq, ca_wkv, ca_bkv, ca_wo.astype(cd), ca_bo,
      ff_w1.astype(cd), ff_b1, ff_w2.astype(cd), ff_b2,
      ln_g, ln_b)

    return jnp.transpose(out_bm, (1, 0, 2))   # back to (T, B, D)


# ---------------------------------------------------------------------------
# Pure-JAX reference (same math) for a sanity check
# ---------------------------------------------------------------------------
def _ref_decoder_layer(tgt, memory, params, tgt_mask, memory_mask, num_heads):
    (sa_wq, sa_bq, sa_wk, sa_bk, sa_wv, sa_bv, sa_wo, sa_bo,
     ca_wq, ca_bq, ca_wk, ca_bk, ca_wv, ca_bv, ca_wo, ca_bo,
     ff_w1, ff_b1, ff_w2, ff_b2,
     ln1_g, ln1_b, ln2_g, ln2_b, ln3_g, ln3_b) = params

    def ln(x, g, b, eps=1e-5):
        mu = jnp.mean(x, -1, keepdims=True)
        var = jnp.mean((x - mu) ** 2, -1, keepdims=True)
        return (x - mu) / jnp.sqrt(var + eps) * g + b

    def mha(xq, xkv, wq, bq, wk, bk, wv, bv, wo, bo, mask):
        T, B, D = xq.shape
        Skv = xkv.shape[0]
        dk = D // num_heads
        q = (xq @ wq + bq).reshape(T, B, num_heads, dk).transpose(1, 2, 0, 3)
        k = (xkv @ wk + bk).reshape(Skv, B, num_heads, dk).transpose(1, 2, 0, 3)
        v = (xkv @ wv + bv).reshape(Skv, B, num_heads, dk).transpose(1, 2, 0, 3)
        s = jnp.einsum("bhtd,bhsd->bhts", q, k) / jnp.sqrt(dk)
        s = jnp.where(mask > 0, s, -1e9)
        p = jax.nn.softmax(s, axis=-1)
        o = jnp.einsum("bhts,bhsd->bhtd", p, v)
        o = o.transpose(2, 0, 1, 3).reshape(T, B, D)
        return o @ wo + bo

    x = ln(tgt + mha(tgt, tgt, sa_wq, sa_bq, sa_wk, sa_bk, sa_wv, sa_bv,
                     sa_wo, sa_bo, tgt_mask), ln1_g, ln1_b)
    x = ln(x + mha(x, memory, ca_wq, ca_bq, ca_wk, ca_bk, ca_wv, ca_bv,
                   ca_wo, ca_bo, memory_mask), ln2_g, ln2_b)
    ff = jnp.maximum(x @ ff_w1 + ff_b1, 0.0) @ ff_w2 + ff_b2
    return ln(x + ff, ln3_g, ln3_b)


# ---------------------------------------------------------------------------
# Main
# ---------------------------------------------------------------------------
if __name__ == "__main__":
    T, S, B = 8, 16, 2         # tgt_seq_len, src_seq_len, batch
    D, H, FF = 32, 4, 64       # d_model, num_heads, d_ff

    key = jax.random.PRNGKey(0)
    keys = jax.random.split(key, 32)
    kit = iter(keys)

    def init_w(shape, scale=0.05):
        return jax.random.normal(next(kit), shape, jnp.float32) * scale

    # Weights stored (in, out); biases stored (1, out).
    params = (
        # self-attn q/k/v/o
        init_w((D, D)), jnp.zeros((1, D), jnp.float32),
        init_w((D, D)), jnp.zeros((1, D), jnp.float32),
        init_w((D, D)), jnp.zeros((1, D), jnp.float32),
        init_w((D, D)), jnp.zeros((1, D), jnp.float32),
        # cross-attn q/k/v/o
        init_w((D, D)), jnp.zeros((1, D), jnp.float32),
        init_w((D, D)), jnp.zeros((1, D), jnp.float32),
        init_w((D, D)), jnp.zeros((1, D), jnp.float32),
        init_w((D, D)), jnp.zeros((1, D), jnp.float32),
        # FFN
        init_w((D, FF)), jnp.zeros((1, FF), jnp.float32),
        init_w((FF, D)), jnp.zeros((1, D), jnp.float32),
        # LayerNorm 1/2/3 (gamma, beta)
        jnp.ones((1, D), jnp.float32), jnp.zeros((1, D), jnp.float32),
        jnp.ones((1, D), jnp.float32), jnp.zeros((1, D), jnp.float32),
        jnp.ones((1, D), jnp.float32), jnp.zeros((1, D), jnp.float32),
    )

    tgt = jax.random.normal(next(kit), (T, B, D), jnp.float32)
    memory = jax.random.normal(next(kit), (S, B, D), jnp.float32)

    # causal target mask, all-ones memory mask (1 = attend, 0 = masked)
    causal = jnp.tril(jnp.ones((T, T), jnp.float32))
    tgt_mask = jnp.broadcast_to(causal, (B, 1, T, T))
    memory_mask = jnp.ones((B, 1, T, S), jnp.float32)

    ref = _ref_decoder_layer(tgt, memory, params, tgt_mask, memory_mask, H)

    # f32 matmul path (approx-reciprocal softmax)
    out = decoder_layer(tgt, memory, params, tgt_mask, memory_mask, H)
    out = jax.block_until_ready(out)
    assert out.shape == (T, B, D)
    assert jnp.allclose(out, ref, atol=1e-2, rtol=1e-2), "f32 kernel mismatch"

    # bf16 matmul operands (v6e / v7x fast path), f32 accumulation
    out_bf16 = decoder_layer(tgt, memory, params, tgt_mask, memory_mask, H,
                             compute_dtype=jnp.bfloat16)
    out_bf16 = jax.block_until_ready(out_bf16)
    assert jnp.allclose(out_bf16, ref, atol=6e-2, rtol=6e-2), "bf16 kernel mismatch"

    print("KERNEL_OK")
</pallas_src>

<mosaic_0001>
module attributes {stable_mosaic.version = 11 : i64} {
  func.func @decoder_layer_kernel(%arg0: i32, %arg1: memref<1x8x32xf32, #tpu.memory_space<vmem>>, %arg2: memref<1x16x32xf32, #tpu.memory_space<vmem>>, %arg3: memref<1x8x8xf32, #tpu.memory_space<vmem>>, %arg4: memref<1x8x16xf32, #tpu.memory_space<vmem>>, %arg5: memref<32x96xf32, #tpu.memory_space<vmem>>, %arg6: memref<1x96xf32, #tpu.memory_space<vmem>>, %arg7: memref<32x32xf32, #tpu.memory_space<vmem>>, %arg8: memref<1x32xf32, #tpu.memory_space<vmem>>, %arg9: memref<32x32xf32, #tpu.memory_space<vmem>>, %arg10: memref<1x32xf32, #tpu.memory_space<vmem>>, %arg11: memref<32x64xf32, #tpu.memory_space<vmem>>, %arg12: memref<1x64xf32, #tpu.memory_space<vmem>>, %arg13: memref<32x32xf32, #tpu.memory_space<vmem>>, %arg14: memref<1x32xf32, #tpu.memory_space<vmem>>, %arg15: memref<32x64xf32, #tpu.memory_space<vmem>>, %arg16: memref<1x64xf32, #tpu.memory_space<vmem>>, %arg17: memref<64x32xf32, #tpu.memory_space<vmem>>, %arg18: memref<1x32xf32, #tpu.memory_space<vmem>>, %arg19: memref<3x32xf32, #tpu.memory_space<vmem>>, %arg20: memref<3x32xf32, #tpu.memory_space<vmem>>, %arg21: memref<1x8x32xf32, #tpu.memory_space<vmem>>) attributes {dimension_semantics = [#tpu.dimension_semantics<parallel>], iteration_bounds = array<i64: 2>, scalar_prefetch = 0 : i64, scratch_operands = 0 : i64, tpu.core_type = #tpu.core_type<tc>, window_params = [{transform_indices = @transform_0, window_bounds = array<i64: 1, 8, 32>}, {transform_indices = @transform_1, window_bounds = array<i64: 1, 16, 32>}, {transform_indices = @transform_2, window_bounds = array<i64: 1, 8, 8>}, {transform_indices = @transform_3, window_bounds = array<i64: 1, 8, 16>}, {pipeline_mode = #tpu.pipeline_mode<synchronous>, transform_indices = @transform_4, window_bounds = array<i64: 32, 96>}, {pipeline_mode = #tpu.pipeline_mode<synchronous>, transform_indices = @transform_5, window_bounds = array<i64: 1, 96>}, {pipeline_mode = #tpu.pipeline_mode<synchronous>, transform_indices = @transform_6, window_bounds = array<i64: 32, 32>}, {pipeline_mode = #tpu.pipeline_mode<synchronous>, transform_indices = @transform_7, window_bounds = array<i64: 1, 32>}, {pipeline_mode = #tpu.pipeline_mode<synchronous>, transform_indices = @transform_8, window_bounds = array<i64: 32, 32>}, {pipeline_mode = #tpu.pipeline_mode<synchronous>, transform_indices = @transform_9, window_bounds = array<i64: 1, 32>}, {pipeline_mode = #tpu.pipeline_mode<synchronous>, transform_indices = @transform_10, window_bounds = array<i64: 32, 64>}, {pipeline_mode = #tpu.pipeline_mode<synchronous>, transform_indices = @transform_11, window_bounds = array<i64: 1, 64>}, {pipeline_mode = #tpu.pipeline_mode<synchronous>, transform_indices = @transform_12, window_bounds = array<i64: 32, 32>}, {pipeline_mode = #tpu.pipeline_mode<synchronous>, transform_indices = @transform_13, window_bounds = array<i64: 1, 32>}, {pipeline_mode = #tpu.pipeline_mode<synchronous>, transform_indices = @transform_14, window_bounds = array<i64: 32, 64>}, {pipeline_mode = #tpu.pipeline_mode<synchronous>, transform_indices = @transform_15, window_bounds = array<i64: 1, 64>}, {pipeline_mode = #tpu.pipeline_mode<synchronous>, transform_indices = @transform_16, window_bounds = array<i64: 64, 32>}, {pipeline_mode = #tpu.pipeline_mode<synchronous>, transform_indices = @transform_17, window_bounds = array<i64: 1, 32>}, {pipeline_mode = #tpu.pipeline_mode<synchronous>, transform_indices = @transform_18, window_bounds = array<i64: 3, 32>}, {pipeline_mode = #tpu.pipeline_mode<synchronous>, transform_indices = @transform_19, window_bounds = array<i64: 3, 32>}, {transform_indices = @transform_20, window_bounds = array<i64: 1, 8, 32>}]} {
    %c0 = arith.constant 0 : index
    %c0_0 = arith.constant 0 : index
    %c0_1 = arith.constant 0 : index
    %0 = vector.load %arg1[%c0, %c0_0, %c0_1] : memref<1x8x32xf32, #tpu.memory_space<vmem>>, vector<1x8x32xf32>
    %1 = vector.shape_cast %0 : vector<1x8x32xf32> to vector<8x32xf32>
    %c0_2 = arith.constant 0 : index
    %c0_3 = arith.constant 0 : index
    %c0_4 = arith.constant 0 : index
    %2 = vector.load %arg2[%c0_2, %c0_3, %c0_4] : memref<1x16x32xf32, #tpu.memory_space<vmem>>, vector<1x16x32xf32>
    %3 = vector.shape_cast %2 : vector<1x16x32xf32> to vector<16x32xf32>
    %c0_5 = arith.constant 0 : index
    %c0_6 = arith.constant 0 : index
    %4 = vector.load %arg19[%c0_5, %c0_6] : memref<3x32xf32, #tpu.memory_space<vmem>>, vector<3x32xf32>
    %c0_7 = arith.constant 0 : index
    %c0_8 = arith.constant 0 : index
    %5 = vector.load %arg20[%c0_7, %c0_8] : memref<3x32xf32, #tpu.memory_space<vmem>>, vector<3x32xf32>
    %c0_9 = arith.constant 0 : index
    %c0_10 = arith.constant 0 : index
    %c0_11 = arith.constant 0 : index
    %6 = vector.load %arg3[%c0_9, %c0_10, %c0_11] : memref<1x8x8xf32, #tpu.memory_space<vmem>>, vector<1x8x8xf32>
    %7 = vector.shape_cast %6 : vector<1x8x8xf32> to vector<8x8xf32>
    %cst = arith.constant 0.000000e+00 : f32
    %8 = vector.broadcast %cst : f32 to vector<8x8xf32>
    %9 = arith.cmpf ogt, %7, %8 : vector<8x8xf32>
    %cst_12 = arith.constant 0.000000e+00 : f32
    %cst_13 = arith.constant -1.000000e+09 : f32
    %10 = vector.broadcast %cst_12 : f32 to vector<8x8xf32>
    %11 = vector.broadcast %cst_13 : f32 to vector<8x8xf32>
    %12 = arith.select %9, %10, %11 : vector<8x8xi1>, vector<8x8xf32>
    %c0_14 = arith.constant 0 : index
    %c0_15 = arith.constant 0 : index
    %c0_16 = arith.constant 0 : index
    %13 = vector.load %arg4[%c0_14, %c0_15, %c0_16] : memref<1x8x16xf32, #tpu.memory_space<vmem>>, vector<1x8x16xf32>
    %14 = vector.shape_cast %13 : vector<1x8x16xf32> to vector<8x16xf32>
    %cst_17 = arith.constant 0.000000e+00 : f32
    %15 = vector.broadcast %cst_17 : f32 to vector<8x16xf32>
    %16 = arith.cmpf ogt, %14, %15 : vector<8x16xf32>
    %cst_18 = arith.constant 0.000000e+00 : f32
    %cst_19 = arith.constant -1.000000e+09 : f32
    %17 = vector.broadcast %cst_18 : f32 to vector<8x16xf32>
    %18 = vector.broadcast %cst_19 : f32 to vector<8x16xf32>
    %19 = arith.select %16, %17, %18 : vector<8x16xi1>, vector<8x16xf32>
    %c0_20 = arith.constant 0 : index
    %c0_21 = arith.constant 0 : index
    %20 = vector.load %arg5[%c0_20, %c0_21] : memref<32x96xf32, #tpu.memory_space<vmem>>, vector<32x96xf32>
    %cst_22 = arith.constant dense<0.000000e+00> : vector<8x96xf32>
    %21 = tpu.matmul %1, %20, %cst_22 {dimension_numbers = #tpu.dot_dimension_numbers<[1], [0], [0], [1], [0, 0, 1, 1], [], []>} : vector<8x32xf32>, vector<32x96xf32>, vector<8x96xf32> -> vector<8x96xf32>
    %c0_23 = arith.constant 0 : index
    %c0_24 = arith.constant 0 : index
    %22 = vector.load %arg6[%c0_23, %c0_24] : memref<1x96xf32, #tpu.memory_space<vmem>>, vector<1x96xf32>
    %23 = vector.broadcast %22 : vector<1x96xf32> to vector<8x96xf32>
    %24 = arith.addf %21, %23 : vector<8x96xf32>
    %25 = vector.extract_strided_slice %24 {offsets = [0, 0], sizes = [8, 32], strides = [1, 1]} : vector<8x96xf32> to vector<8x32xf32>
    %cst_25 = arith.constant 0.353553385 : f32
    %26 = vector.broadcast %cst_25 : f32 to vector<8x32xf32>
    %27 = arith.mulf %25, %26 : vector<8x32xf32>
    %28 = vector.extract_strided_slice %24 {offsets = [0, 32], sizes = [8, 32], strides = [1, 1]} : vector<8x96xf32> to vector<8x32xf32>
    %29 = vector.extract_strided_slice %24 {offsets = [0, 64], sizes = [8, 32], strides = [1, 1]} : vector<8x96xf32> to vector<8x32xf32>
    %c0_26 = arith.constant 0 : index
    %c0_27 = arith.constant 0 : index
    %30 = vector.load %arg7[%c0_26, %c0_27] : memref<32x32xf32, #tpu.memory_space<vmem>>, vector<32x32xf32>
    %c0_28 = arith.constant 0 : index
    %c0_29 = arith.constant 0 : index
    %31 = vector.load %arg8[%c0_28, %c0_29] : memref<1x32xf32, #tpu.memory_space<vmem>>, vector<1x32xf32>
    %32 = vector.extract_strided_slice %27 {offsets = [0, 0], sizes = [8, 8], strides = [1, 1]} : vector<8x32xf32> to vector<8x8xf32>
    %33 = vector.extract_strided_slice %27 {offsets = [0, 8], sizes = [8, 8], strides = [1, 1]} : vector<8x32xf32> to vector<8x8xf32>
    %34 = vector.extract_strided_slice %27 {offsets = [0, 16], sizes = [8, 8], strides = [1, 1]} : vector<8x32xf32> to vector<8x8xf32>
    %35 = vector.extract_strided_slice %27 {offsets = [0, 24], sizes = [8, 8], strides = [1, 1]} : vector<8x32xf32> to vector<8x8xf32>
    %36 = vector.shape_cast %32 : vector<8x8xf32> to vector<1x8x8xf32>
    %37 = vector.shape_cast %33 : vector<8x8xf32> to vector<1x8x8xf32>
    %38 = vector.shape_cast %34 : vector<8x8xf32> to vector<1x8x8xf32>
    %39 = vector.shape_cast %35 : vector<8x8xf32> to vector<1x8x8xf32>
    %40 = tpu.concatenate %36, %37, %38, %39 in 0 : vector<1x8x8xf32>, vector<1x8x8xf32>, vector<1x8x8xf32>, vector<1x8x8xf32> -> vector<4x8x8xf32>
    %41 = vector.extract_strided_slice %28 {offsets = [0, 0], sizes = [8, 8], strides = [1, 1]} : vector<8x32xf32> to vector<8x8xf32>
    %42 = vector.extract_strided_slice %28 {offsets = [0, 8], sizes = [8, 8], strides = [1, 1]} : vector<8x32xf32> to vector<8x8xf32>
    %43 = vector.extract_strided_slice %28 {offsets = [0, 16], sizes = [8, 8], strides = [1, 1]} : vector<8x32xf32> to vector<8x8xf32>
    %44 = vector.extract_strided_slice %28 {offsets = [0, 24], sizes = [8, 8], strides = [1, 1]} : vector<8x32xf32> to vector<8x8xf32>
    %45 = vector.shape_cast %41 : vector<8x8xf32> to vector<1x8x8xf32>
    %46 = vector.shape_cast %42 : vector<8x8xf32> to vector<1x8x8xf32>
    %47 = vector.shape_cast %43 : vector<8x8xf32> to vector<1x8x8xf32>
    %48 = vector.shape_cast %44 : vector<8x8xf32> to vector<1x8x8xf32>
    %49 = tpu.concatenate %45, %46, %47, %48 in 0 : vector<1x8x8xf32>, vector<1x8x8xf32>, vector<1x8x8xf32>, vector<1x8x8xf32> -> vector<4x8x8xf32>
    %50 = vector.extract_strided_slice %29 {offsets = [0, 0], sizes = [8, 8], strides = [1, 1]} : vector<8x32xf32> to vector<8x8xf32>
    %51 = vector.extract_strided_slice %29 {offsets = [0, 8], sizes = [8, 8], strides = [1, 1]} : vector<8x32xf32> to vector<8x8xf32>
    %52 = vector.extract_strided_slice %29 {offsets = [0, 16], sizes = [8, 8], strides = [1, 1]} : vector<8x32xf32> to vector<8x8xf32>
    %53 = vector.extract_strided_slice %29 {offsets = [0, 24], sizes = [8, 8], strides = [1, 1]} : vector<8x32xf32> to vector<8x8xf32>
    %54 = vector.shape_cast %50 : vector<8x8xf32> to vector<1x8x8xf32>
    %55 = vector.shape_cast %51 : vector<8x8xf32> to vector<1x8x8xf32>
    %56 = vector.shape_cast %52 : vector<8x8xf32> to vector<1x8x8xf32>
    %57 = vector.shape_cast %53 : vector<8x8xf32> to vector<1x8x8xf32>
    %58 = tpu.concatenate %54, %55, %56, %57 in 0 : vector<1x8x8xf32>, vector<1x8x8xf32>, vector<1x8x8xf32>, vector<1x8x8xf32> -> vector<4x8x8xf32>
    "tpu.trace_start"() <{level = 10 : i32, message = "htd,hsd->hts"}> : () -> ()
    %cst_30 = arith.constant dense<0.000000e+00> : vector<4x8x8xf32>
    %59 = tpu.matmul %40, %49, %cst_30 {dimension_numbers = #tpu.dot_dimension_numbers<[2], [2], [1], [1], [0, 0, 0, 1, 1, 1], [0], [0]>} : vector<4x8x8xf32>, vector<4x8x8xf32>, vector<4x8x8xf32> -> vector<4x8x8xf32>
    "tpu.trace_stop"() : () -> ()
    %60 = vector.shape_cast %12 : vector<8x8xf32> to vector<1x8x8xf32>
    %61 = vector.broadcast %60 : vector<1x8x8xf32> to vector<4x8x8xf32>
    %62 = arith.addf %59, %61 : vector<4x8x8xf32>
    %cst_31 = arith.constant dense<0xFF800000> : vector<4x8xf32>
    %63 = vector.multi_reduction <maximumf>, %62, %cst_31 [2] : vector<4x8x8xf32> to vector<4x8xf32>
    %64 = vector.shape_cast %63 : vector<4x8xf32> to vector<4x8x1xf32>
    %65 = vector.broadcast %64 : vector<4x8x1xf32> to vector<4x8x8xf32>
    %66 = arith.subf %62, %65 : vector<4x8x8xf32>
    %67 = math.exp %66 : vector<4x8x8xf32>
    %cst_32 = arith.constant dense<0.000000e+00> : vector<4x8xf32>
    %68 = vector.multi_reduction <add>, %67, %cst_32 [2] : vector<4x8x8xf32> to vector<4x8xf32>
    %69 = vector.shape_cast %68 : vector<4x8xf32> to vector<4x8x1xf32>
    %70 = tpu.reciprocal %69 {approx = true} : vector<4x8x1xf32> -> vector<4x8x1xf32>
    %71 = vector.broadcast %70 : vector<4x8x1xf32> to vector<4x8x8xf32>
    %72 = arith.mulf %67, %71 : vector<4x8x8xf32>
    "tpu.trace_start"() <{level = 10 : i32, message = "hts,hsd->htd"}> : () -> ()
    %cst_33 = arith.constant dense<0.000000e+00> : vector<4x8x8xf32>
    %73 = tpu.matmul %72, %58, %cst_33 {dimension_numbers = #tpu.dot_dimension_numbers<[2], [1], [1], [2], [0, 0, 0, 1, 1, 2], [0], [0]>} : vector<4x8x8xf32>, vector<4x8x8xf32>, vector<4x8x8xf32> -> vector<4x8x8xf32>
    "tpu.trace_stop"() : () -> ()
    %74 = vector.extract_strided_slice %73 {offsets = [0, 0, 0], sizes = [1, 8, 8], strides = [1, 1, 1]} : vector<4x8x8xf32> to vector<1x8x8xf32>
    %75 = vector.shape_cast %74 : vector<1x8x8xf32> to vector<8x8xf32>
    %76 = vector.extract_strided_slice %73 {offsets = [1, 0, 0], sizes = [1, 8, 8], strides = [1, 1, 1]} : vector<4x8x8xf32> to vector<1x8x8xf32>
    %77 = vector.shape_cast %76 : vector<1x8x8xf32> to vector<8x8xf32>
    %78 = vector.extract_strided_slice %73 {offsets = [2, 0, 0], sizes = [1, 8, 8], strides = [1, 1, 1]} : vector<4x8x8xf32> to vector<1x8x8xf32>
    %79 = vector.shape_cast %78 : vector<1x8x8xf32> to vector<8x8xf32>
    %80 = vector.extract_strided_slice %73 {offsets = [3, 0, 0], sizes = [1, 8, 8], strides = [1, 1, 1]} : vector<4x8x8xf32> to vector<1x8x8xf32>
    %81 = vector.shape_cast %80 : vector<1x8x8xf32> to vector<8x8xf32>
    %82 = tpu.concatenate %75, %77, %79, %81 in 1 : vector<8x8xf32>, vector<8x8xf32>, vector<8x8xf32>, vector<8x8xf32> -> vector<8x32xf32>
    %cst_34 = arith.constant dense<0.000000e+00> : vector<8x32xf32>
    %83 = tpu.matmul %82, %30, %cst_34 {dimension_numbers = #tpu.dot_dimension_numbers<[1], [0], [0], [1], [0, 0, 1, 1], [], []>} : vector<8x32xf32>, vector<32x32xf32>, vector<8x32xf32> -> vector<8x32xf32>
    %84 = vector.broadcast %31 : vector<1x32xf32> to vector<8x32xf32>
    %85 = arith.addf %83, %84 : vector<8x32xf32>
    %86 = arith.addf %1, %85 : vector<8x32xf32>
    %87 = vector.extract_strided_slice %4 {offsets = [0, 0], sizes = [1, 32], strides = [1, 1]} : vector<3x32xf32> to vector<1x32xf32>
    %88 = vector.extract_strided_slice %5 {offsets = [0, 0], sizes = [1, 32], strides = [1, 1]} : vector<3x32xf32> to vector<1x32xf32>
    %cst_35 = arith.constant dense<0.000000e+00> : vector<8xf32>
    %89 = vector.multi_reduction <add>, %86, %cst_35 [1] : vector<8x32xf32> to vector<8xf32>
    %90 = vector.shape_cast %89 : vector<8xf32> to vector<8x1xf32>
    %cst_36 = arith.constant 3.200000e+01 : f32
    %91 = vector.broadcast %cst_36 : f32 to vector<8x1xf32>
    %92 = arith.divf %90, %91 : vector<8x1xf32>
    %93 = vector.broadcast %92 : vector<8x1xf32> to vector<8x32xf32>
    %94 = arith.subf %86, %93 : vector<8x32xf32>
    %95 = arith.mulf %94, %94 : vector<8x32xf32>
    %cst_37 = arith.constant dense<0.000000e+00> : vector<8xf32>
    %96 = vector.multi_reduction <add>, %95, %cst_37 [1] : vector<8x32xf32> to vector<8xf32>
    %97 = vector.shape_cast %96 : vector<8xf32> to vector<8x1xf32>
    %cst_38 = arith.constant 3.200000e+01 : f32
    %98 = vector.broadcast %cst_38 : f32 to vector<8x1xf32>
    %99 = arith.divf %97, %98 : vector<8x1xf32>
    %100 = vector.broadcast %92 : vector<8x1xf32> to vector<8x32xf32>
    %101 = arith.subf %86, %100 : vector<8x32xf32>
    %cst_39 = arith.constant 9.99999974E-6 : f32
    %102 = vector.broadcast %cst_39 : f32 to vector<8x1xf32>
    %103 = arith.addf %99, %102 : vector<8x1xf32>
    %104 = math.rsqrt %103 : vector<8x1xf32>
    %105 = vector.broadcast %104 : vector<8x1xf32> to vector<8x32xf32>
    %106 = arith.mulf %101, %105 : vector<8x32xf32>
    %107 = vector.broadcast %87 : vector<1x32xf32> to vector<8x32xf32>
    %108 = arith.mulf %106, %107 : vector<8x32xf32>
    %109 = vector.broadcast %88 : vector<1x32xf32> to vector<8x32xf32>
    %110 = arith.addf %108, %109 : vector<8x32xf32>
    %c0_40 = arith.constant 0 : index
    %c0_41 = arith.constant 0 : index
    %111 = vector.load %arg9[%c0_40, %c0_41] : memref<32x32xf32, #tpu.memory_space<vmem>>, vector<32x32xf32>
    %cst_42 = arith.constant dense<0.000000e+00> : vector<8x32xf32>
    %112 = tpu.matmul %110, %111, %cst_42 {dimension_numbers = #tpu.dot_dimension_numbers<[1], [0], [0], [1], [0, 0, 1, 1], [], []>} : vector<8x32xf32>, vector<32x32xf32>, vector<8x32xf32> -> vector<8x32xf32>
    %c0_43 = arith.constant 0 : index
    %c0_44 = arith.constant 0 : index
    %113 = vector.load %arg10[%c0_43, %c0_44] : memref<1x32xf32, #tpu.memory_space<vmem>>, vector<1x32xf32>
    %114 = vector.broadcast %113 : vector<1x32xf32> to vector<8x32xf32>
    %115 = arith.addf %112, %114 : vector<8x32xf32>
    %cst_45 = arith.constant 0.353553385 : f32
    %116 = vector.broadcast %cst_45 : f32 to vector<8x32xf32>
    %117 = arith.mulf %115, %116 : vector<8x32xf32>
    %c0_46 = arith.constant 0 : index
    %c0_47 = arith.constant 0 : index
    %118 = vector.load %arg11[%c0_46, %c0_47] : memref<32x64xf32, #tpu.memory_space<vmem>>, vector<32x64xf32>
    %cst_48 = arith.constant dense<0.000000e+00> : vector<16x64xf32>
    %119 = tpu.matmul %3, %118, %cst_48 {dimension_numbers = #tpu.dot_dimension_numbers<[1], [0], [0], [1], [0, 0, 1, 1], [], []>} : vector<16x32xf32>, vector<32x64xf32>, vector<16x64xf32> -> vector<16x64xf32>
    %c0_49 = arith.constant 0 : index
    %c0_50 = arith.constant 0 : index
    %120 = vector.load %arg12[%c0_49, %c0_50] : memref<1x64xf32, #tpu.memory_space<vmem>>, vector<1x64xf32>
    %121 = vector.broadcast %120 : vector<1x64xf32> to vector<16x64xf32>
    %122 = arith.addf %119, %121 : vector<16x64xf32>
    %123 = vector.extract_strided_slice %122 {offsets = [0, 0], sizes = [16, 32], strides = [1, 1]} : vector<16x64xf32> to vector<16x32xf32>
    %124 = vector.extract_strided_slice %122 {offsets = [0, 32], sizes = [16, 32], strides = [1, 1]} : vector<16x64xf32> to vector<16x32xf32>
    %c0_51 = arith.constant 0 : index
    %c0_52 = arith.constant 0 : index
    %125 = vector.load %arg13[%c0_51, %c0_52] : memref<32x32xf32, #tpu.memory_space<vmem>>, vector<32x32xf32>
    %c0_53 = arith.constant 0 : index
    %c0_54 = arith.constant 0 : index
    %126 = vector.load %arg14[%c0_53, %c0_54] : memref<1x32xf32, #tpu.memory_space<vmem>>, vector<1x32xf32>
    %127 = vector.extract_strided_slice %117 {offsets = [0, 0], sizes = [8, 8], strides = [1, 1]} : vector<8x32xf32> to vector<8x8xf32>
    %128 = vector.extract_strided_slice %117 {offsets = [0, 8], sizes = [8, 8], strides = [1, 1]} : vector<8x32xf32> to vector<8x8xf32>
    %129 = vector.extract_strided_slice %117 {offsets = [0, 16], sizes = [8, 8], strides = [1, 1]} : vector<8x32xf32> to vector<8x8xf32>
    %130 = vector.extract_strided_slice %117 {offsets = [0, 24], sizes = [8, 8], strides = [1, 1]} : vector<8x32xf32> to vector<8x8xf32>
    %131 = vector.shape_cast %127 : vector<8x8xf32> to vector<1x8x8xf32>
    %132 = vector.shape_cast %128 : vector<8x8xf32> to vector<1x8x8xf32>
    %133 = vector.shape_cast %129 : vector<8x8xf32> to vector<1x8x8xf32>
    %134 = vector.shape_cast %130 : vector<8x8xf32> to vector<1x8x8xf32>
    %135 = tpu.concatenate %131, %132, %133, %134 in 0 : vector<1x8x8xf32>, vector<1x8x8xf32>, vector<1x8x8xf32>, vector<1x8x8xf32> -> vector<4x8x8xf32>
    %136 = vector.extract_strided_slice %123 {offsets = [0, 0], sizes = [16, 8], strides = [1, 1]} : vector<16x32xf32> to vector<16x8xf32>
    %137 = vector.extract_strided_slice %123 {offsets = [0, 8], sizes = [16, 8], strides = [1, 1]} : vector<16x32xf32> to vector<16x8xf32>
    %138 = vector.extract_strided_slice %123 {offsets = [0, 16], sizes = [16, 8], strides = [1, 1]} : vector<16x32xf32> to vector<16x8xf32>
    %139 = vector.extract_strided_slice %123 {offsets = [0, 24], sizes = [16, 8], strides = [1, 1]} : vector<16x32xf32> to vector<16x8xf32>
    %140 = vector.shape_cast %136 : vector<16x8xf32> to vector<1x16x8xf32>
    %141 = vector.shape_cast %137 : vector<16x8xf32> to vector<1x16x8xf32>
    %142 = vector.shape_cast %138 : vector<16x8xf32> to vector<1x16x8xf32>
    %143 = vector.shape_cast %139 : vector<16x8xf32> to vector<1x16x8xf32>
    %144 = tpu.concatenate %140, %141, %142, %143 in 0 : vector<1x16x8xf32>, vector<1x16x8xf32>, vector<1x16x8xf32>, vector<1x16x8xf32> -> vector<4x16x8xf32>
    %145 = vector.extract_strided_slice %124 {offsets = [0, 0], sizes = [16, 8], strides = [1, 1]} : vector<16x32xf32> to vector<16x8xf32>
    %146 = vector.extract_strided_slice %124 {offsets = [0, 8], sizes = [16, 8], strides = [1, 1]} : vector<16x32xf32> to vector<16x8xf32>
    %147 = vector.extract_strided_slice %124 {offsets = [0, 16], sizes = [16, 8], strides = [1, 1]} : vector<16x32xf32> to vector<16x8xf32>
    %148 = vector.extract_strided_slice %124 {offsets = [0, 24], sizes = [16, 8], strides = [1, 1]} : vector<16x32xf32> to vector<16x8xf32>
    %149 = vector.shape_cast %145 : vector<16x8xf32> to vector<1x16x8xf32>
    %150 = vector.shape_cast %146 : vector<16x8xf32> to vector<1x16x8xf32>
    %151 = vector.shape_cast %147 : vector<16x8xf32> to vector<1x16x8xf32>
    %152 = vector.shape_cast %148 : vector<16x8xf32> to vector<1x16x8xf32>
    %153 = tpu.concatenate %149, %150, %151, %152 in 0 : vector<1x16x8xf32>, vector<1x16x8xf32>, vector<1x16x8xf32>, vector<1x16x8xf32> -> vector<4x16x8xf32>
    "tpu.trace_start"() <{level = 10 : i32, message = "htd,hsd->hts"}> : () -> ()
    %cst_55 = arith.constant dense<0.000000e+00> : vector<4x8x16xf32>
    %154 = tpu.matmul %135, %144, %cst_55 {dimension_numbers = #tpu.dot_dimension_numbers<[2], [2], [1], [1], [0, 0, 0, 1, 1, 1], [0], [0]>} : vector<4x8x8xf32>, vector<4x16x8xf32>, vector<4x8x16xf32> -> vector<4x8x16xf32>
    "tpu.trace_stop"() : () -> ()
    %155 = vector.shape_cast %19 : vector<8x16xf32> to vector<1x8x16xf32>
    %156 = vector.broadcast %155 : vector<1x8x16xf32> to vector<4x8x16xf32>
    %157 = arith.addf %154, %156 : vector<4x8x16xf32>
    %cst_56 = arith.constant dense<0xFF800000> : vector<4x8xf32>
    %158 = vector.multi_reduction <maximumf>, %157, %cst_56 [2] : vector<4x8x16xf32> to vector<4x8xf32>
    %159 = vector.shape_cast %158 : vector<4x8xf32> to vector<4x8x1xf32>
    %160 = vector.broadcast %159 : vector<4x8x1xf32> to vector<4x8x16xf32>
    %161 = arith.subf %157, %160 : vector<4x8x16xf32>
    %162 = math.exp %161 : vector<4x8x16xf32>
    %cst_57 = arith.constant dense<0.000000e+00> : vector<4x8xf32>
    %163 = vector.multi_reduction <add>, %162, %cst_57 [2] : vector<4x8x16xf32> to vector<4x8xf32>
    %164 = vector.shape_cast %163 : vector<4x8xf32> to vector<4x8x1xf32>
    %165 = tpu.reciprocal %164 {approx = true} : vector<4x8x1xf32> -> vector<4x8x1xf32>
    %166 = vector.broadcast %165 : vector<4x8x1xf32> to vector<4x8x16xf32>
    %167 = arith.mulf %162, %166 : vector<4x8x16xf32>
    "tpu.trace_start"() <{level = 10 : i32, message = "hts,hsd->htd"}> : () -> ()
    %cst_58 = arith.constant dense<0.000000e+00> : vector<4x8x8xf32>
    %168 = tpu.matmul %167, %153, %cst_58 {dimension_numbers = #tpu.dot_dimension_numbers<[2], [1], [1], [2], [0, 0, 0, 1, 1, 2], [0], [0]>} : vector<4x8x16xf32>, vector<4x16x8xf32>, vector<4x8x8xf32> -> vector<4x8x8xf32>
    "tpu.trace_stop"() : () -> ()
    %169 = vector.extract_strided_slice %168 {offsets = [0, 0, 0], sizes = [1, 8, 8], strides = [1, 1, 1]} : vector<4x8x8xf32> to vector<1x8x8xf32>
    %170 = vector.shape_cast %169 : vector<1x8x8xf32> to vector<8x8xf32>
    %171 = vector.extract_strided_slice %168 {offsets = [1, 0, 0], sizes = [1, 8, 8], strides = [1, 1, 1]} : vector<4x8x8xf32> to vector<1x8x8xf32>
    %172 = vector.shape_cast %171 : vector<1x8x8xf32> to vector<8x8xf32>
    %173 = vector.extract_strided_slice %168 {offsets = [2, 0, 0], sizes = [1, 8, 8], strides = [1, 1, 1]} : vector<4x8x8xf32> to vector<1x8x8xf32>
    %174 = vector.shape_cast %173 : vector<1x8x8xf32> to vector<8x8xf32>
    %175 = vector.extract_strided_slice %168 {offsets = [3, 0, 0], sizes = [1, 8, 8], strides = [1, 1, 1]} : vector<4x8x8xf32> to vector<1x8x8xf32>
    %176 = vector.shape_cast %175 : vector<1x8x8xf32> to vector<8x8xf32>
    %177 = tpu.concatenate %170, %172, %174, %176 in 1 : vector<8x8xf32>, vector<8x8xf32>, vector<8x8xf32>, vector<8x8xf32> -> vector<8x32xf32>
    %cst_59 = arith.constant dense<0.000000e+00> : vector<8x32xf32>
    %178 = tpu.matmul %177, %125, %cst_59 {dimension_numbers = #tpu.dot_dimension_numbers<[1], [0], [0], [1], [0, 0, 1, 1], [], []>} : vector<8x32xf32>, vector<32x32xf32>, vector<8x32xf32> -> vector<8x32xf32>
    %179 = vector.broadcast %126 : vector<1x32xf32> to vector<8x32xf32>
    %180 = arith.addf %178, %179 : vector<8x32xf32>
    %181 = arith.addf %110, %180 : vector<8x32xf32>
    %182 = vector.extract_strided_slice %4 {offsets = [1, 0], sizes = [1, 32], strides = [1, 1]} : vector<3x32xf32> to vector<1x32xf32>
    %183 = vector.extract_strided_slice %5 {offsets = [1, 0], sizes = [1, 32], strides = [1, 1]} : vector<3x32xf32> to vector<1x32xf32>
    %cst_60 = arith.constant dense<0.000000e+00> : vector<8xf32>
    %184 = vector.multi_reduction <add>, %181, %cst_60 [1] : vector<8x32xf32> to vector<8xf32>
    %185 = vector.shape_cast %184 : vector<8xf32> to vector<8x1xf32>
    %cst_61 = arith.constant 3.200000e+01 : f32
    %186 = vector.broadcast %cst_61 : f32 to vector<8x1xf32>
    %187 = arith.divf %185, %186 : vector<8x1xf32>
    %188 = vector.broadcast %187 : vector<8x1xf32> to vector<8x32xf32>
    %189 = arith.subf %181, %188 : vector<8x32xf32>
    %190 = arith.mulf %189, %189 : vector<8x32xf32>
    %cst_62 = arith.constant dense<0.000000e+00> : vector<8xf32>
    %191 = vector.multi_reduction <add>, %190, %cst_62 [1] : vector<8x32xf32> to vector<8xf32>
    %192 = vector.shape_cast %191 : vector<8xf32> to vector<8x1xf32>
    %cst_63 = arith.constant 3.200000e+01 : f32
    %193 = vector.broadcast %cst_63 : f32 to vector<8x1xf32>
    %194 = arith.divf %192, %193 : vector<8x1xf32>
    %195 = vector.broadcast %187 : vector<8x1xf32> to vector<8x32xf32>
    %196 = arith.subf %181, %195 : vector<8x32xf32>
    %cst_64 = arith.constant 9.99999974E-6 : f32
    %197 = vector.broadcast %cst_64 : f32 to vector<8x1xf32>
    %198 = arith.addf %194, %197 : vector<8x1xf32>
    %199 = math.rsqrt %198 : vector<8x1xf32>
    %200 = vector.broadcast %199 : vector<8x1xf32> to vector<8x32xf32>
    %201 = arith.mulf %196, %200 : vector<8x32xf32>
    %202 = vector.broadcast %182 : vector<1x32xf32> to vector<8x32xf32>
    %203 = arith.mulf %201, %202 : vector<8x32xf32>
    %204 = vector.broadcast %183 : vector<1x32xf32> to vector<8x32xf32>
    %205 = arith.addf %203, %204 : vector<8x32xf32>
    %c0_65 = arith.constant 0 : index
    %c0_66 = arith.constant 0 : index
    %206 = vector.load %arg15[%c0_65, %c0_66] : memref<32x64xf32, #tpu.memory_space<vmem>>, vector<32x64xf32>
    %cst_67 = arith.constant dense<0.000000e+00> : vector<8x64xf32>
    %207 = tpu.matmul %205, %206, %cst_67 {dimension_numbers = #tpu.dot_dimension_numbers<[1], [0], [0], [1], [0, 0, 1, 1], [], []>} : vector<8x32xf32>, vector<32x64xf32>, vector<8x64xf32> -> vector<8x64xf32>
    %c0_68 = arith.constant 0 : index
    %c0_69 = arith.constant 0 : index
    %208 = vector.load %arg16[%c0_68, %c0_69] : memref<1x64xf32, #tpu.memory_space<vmem>>, vector<1x64xf32>
    %209 = vector.broadcast %208 : vector<1x64xf32> to vector<8x64xf32>
    %210 = arith.addf %207, %209 : vector<8x64xf32>
    %cst_70 = arith.constant 0.000000e+00 : f32
    %211 = vector.broadcast %cst_70 : f32 to vector<8x64xf32>
    %212 = arith.maximumf %210, %211 : vector<8x64xf32>
    %c0_71 = arith.constant 0 : index
    %c0_72 = arith.constant 0 : index
    %213 = vector.load %arg17[%c0_71, %c0_72] : memref<64x32xf32, #tpu.memory_space<vmem>>, vector<64x32xf32>
    %cst_73 = arith.constant dense<0.000000e+00> : vector<8x32xf32>
    %214 = tpu.matmul %212, %213, %cst_73 {dimension_numbers = #tpu.dot_dimension_numbers<[1], [0], [0], [1], [0, 0, 1, 1], [], []>} : vector<8x64xf32>, vector<64x32xf32>, vector<8x32xf32> -> vector<8x32xf32>
    %c0_74 = arith.constant 0 : index
    %c0_75 = arith.constant 0 : index
    %215 = vector.load %arg18[%c0_74, %c0_75] : memref<1x32xf32, #tpu.memory_space<vmem>>, vector<1x32xf32>
    %216 = vector.broadcast %215 : vector<1x32xf32> to vector<8x32xf32>
    %217 = arith.addf %214, %216 : vector<8x32xf32>
    %218 = arith.addf %205, %217 : vector<8x32xf32>
    %219 = vector.extract_strided_slice %4 {offsets = [2, 0], sizes = [1, 32], strides = [1, 1]} : vector<3x32xf32> to vector<1x32xf32>
    %220 = vector.extract_strided_slice %5 {offsets = [2, 0], sizes = [1, 32], strides = [1, 1]} : vector<3x32xf32> to vector<1x32xf32>
    %cst_76 = arith.constant dense<0.000000e+00> : vector<8xf32>
    %221 = vector.multi_reduction <add>, %218, %cst_76 [1] : vector<8x32xf32> to vector<8xf32>
    %222 = vector.shape_cast %221 : vector<8xf32> to vector<8x1xf32>
    %cst_77 = arith.constant 3.200000e+01 : f32
    %223 = vector.broadcast %cst_77 : f32 to vector<8x1xf32>
    %224 = arith.divf %222, %223 : vector<8x1xf32>
    %225 = vector.broadcast %224 : vector<8x1xf32> to vector<8x32xf32>
    %226 = arith.subf %218, %225 : vector<8x32xf32>
    %227 = arith.mulf %226, %226 : vector<8x32xf32>
    %cst_78 = arith.constant dense<0.000000e+00> : vector<8xf32>
    %228 = vector.multi_reduction <add>, %227, %cst_78 [1] : vector<8x32xf32> to vector<8xf32>
    %229 = vector.shape_cast %228 : vector<8xf32> to vector<8x1xf32>
    %cst_79 = arith.constant 3.200000e+01 : f32
    %230 = vector.broadcast %cst_79 : f32 to vector<8x1xf32>
    %231 = arith.divf %229, %230 : vector<8x1xf32>
    %232 = vector.broadcast %224 : vector<8x1xf32> to vector<8x32xf32>
    %233 = arith.subf %218, %232 : vector<8x32xf32>
    %cst_80 = arith.constant 9.99999974E-6 : f32
    %234 = vector.broadcast %cst_80 : f32 to vector<8x1xf32>
    %235 = arith.addf %231, %234 : vector<8x1xf32>
    %236 = math.rsqrt %235 : vector<8x1xf32>
    %237 = vector.broadcast %236 : vector<8x1xf32> to vector<8x32xf32>
    %238 = arith.mulf %233, %237 : vector<8x32xf32>
    %239 = vector.broadcast %219 : vector<1x32xf32> to vector<8x32xf32>
    %240 = arith.mulf %238, %239 : vector<8x32xf32>
    %241 = vector.broadcast %220 : vector<1x32xf32> to vector<8x32xf32>
    %242 = arith.addf %240, %241 : vector<8x32xf32>
    %c0_81 = arith.constant 0 : index
    %c0_82 = arith.constant 0 : index
    %c0_83 = arith.constant 0 : index
    %243 = vector.load %arg21[%c0_81, %c0_82, %c0_83] : memref<1x8x32xf32, #tpu.memory_space<vmem>>, vector<1x8x32xf32>
    %244 = vector.shape_cast %243 : vector<1x8x32xf32> to vector<8x32xf32>
    %245 = vector.shape_cast %242 : vector<8x32xf32> to vector<1x8x32xf32>
    tpu.vector_store %arg21[%c0_81, %c0_82, %c0_83], %245 {strides = array<i32>} : memref<1x8x32xf32, #tpu.memory_space<vmem>>, vector<1x8x32xf32>,
    return
  }
  func.func @transform_0(%arg0: i32) -> (i32, i32, i32) {
    %c0_i32 = arith.constant 0 : i32
    %c0_i32_0 = arith.constant 0 : i32
    %c0_i32_1 = arith.constant 0 : i32
    return %arg0, %c0_i32, %c0_i32_0 : i32, i32, i32
  }
  func.func @transform_1(%arg0: i32) -> (i32, i32, i32) {
    %c0_i32 = arith.constant 0 : i32
    %c0_i32_0 = arith.constant 0 : i32
    %c0_i32_1 = arith.constant 0 : i32
    return %arg0, %c0_i32, %c0_i32_0 : i32, i32, i32
  }
  func.func @transform_2(%arg0: i32) -> (i32, i32, i32) {
    %c0_i32 = arith.constant 0 : i32
    %c0_i32_0 = arith.constant 0 : i32
    %c0_i32_1 = arith.constant 0 : i32
    return %arg0, %c0_i32, %c0_i32_0 : i32, i32, i32
  }
  func.func @transform_3(%arg0: i32) -> (i32, i32, i32) {
    %c0_i32 = arith.constant 0 : i32
    %c0_i32_0 = arith.constant 0 : i32
    %c0_i32_1 = arith.constant 0 : i32
    return %arg0, %c0_i32, %c0_i32_0 : i32, i32, i32
  }
  func.func @transform_4(%arg0: i32) -> (i32, i32) {
    %c0_i32 = arith.constant 0 : i32
    %c0_i32_0 = arith.constant 0 : i32
    %c0_i32_1 = arith.constant 0 : i32
    return %c0_i32, %c0_i32_0 : i32, i32
  }
  func.func @transform_5(%arg0: i32) -> (i32, i32) {
    %c0_i32 = arith.constant 0 : i32
    %c0_i32_0 = arith.constant 0 : i32
    %c0_i32_1 = arith.constant 0 : i32
    return %c0_i32, %c0_i32_0 : i32, i32
  }
  func.func @transform_6(%arg0: i32) -> (i32, i32) {
    %c0_i32 = arith.constant 0 : i32
    %c0_i32_0 = arith.constant 0 : i32
    %c0_i32_1 = arith.constant 0 : i32
    return %c0_i32, %c0_i32_0 : i32, i32
  }
  func.func @transform_7(%arg0: i32) -> (i32, i32) {
    %c0_i32 = arith.constant 0 : i32
    %c0_i32_0 = arith.constant 0 : i32
    %c0_i32_1 = arith.constant 0 : i32
    return %c0_i32, %c0_i32_0 : i32, i32
  }
  func.func @transform_8(%arg0: i32) -> (i32, i32) {
    %c0_i32 = arith.constant 0 : i32
    %c0_i32_0 = arith.constant 0 : i32
    %c0_i32_1 = arith.constant 0 : i32
    return %c0_i32, %c0_i32_0 : i32, i32
  }
  func.func @transform_9(%arg0: i32) -> (i32, i32) {
    %c0_i32 = arith.constant 0 : i32
    %c0_i32_0 = arith.constant 0 : i32
    %c0_i32_1 = arith.constant 0 : i32
    return %c0_i32, %c0_i32_0 : i32, i32
  }
  func.func @transform_10(%arg0: i32) -> (i32, i32) {
    %c0_i32 = arith.constant 0 : i32
    %c0_i32_0 = arith.constant 0 : i32
    %c0_i32_1 = arith.constant 0 : i32
    return %c0_i32, %c0_i32_0 : i32, i32
  }
  func.func @transform_11(%arg0: i32) -> (i32, i32) {
    %c0_i32 = arith.constant 0 : i32
    %c0_i32_0 = arith.constant 0 : i32
    %c0_i32_1 = arith.constant 0 : i32
    return %c0_i32, %c0_i32_0 : i32, i32
  }
  func.func @transform_12(%arg0: i32) -> (i32, i32) {
    %c0_i32 = arith.constant 0 : i32
    %c0_i32_0 = arith.constant 0 : i32
    %c0_i32_1 = arith.constant 0 : i32
    return %c0_i32, %c0_i32_0 : i32, i32
  }
  func.func @transform_13(%arg0: i32) -> (i32, i32) {
    %c0_i32 = arith.constant 0 : i32
    %c0_i32_0 = arith.constant 0 : i32
    %c0_i32_1 = arith.constant 0 : i32
    return %c0_i32, %c0_i32_0 : i32, i32
  }
  func.func @transform_14(%arg0: i32) -> (i32, i32) {
    %c0_i32 = arith.constant 0 : i32
    %c0_i32_0 = arith.constant 0 : i32
    %c0_i32_1 = arith.constant 0 : i32
    return %c0_i32, %c0_i32_0 : i32, i32
  }
  func.func @transform_15(%arg0: i32) -> (i32, i32) {
    %c0_i32 = arith.constant 0 : i32
    %c0_i32_0 = arith.constant 0 : i32
    %c0_i32_1 = arith.constant 0 : i32
    return %c0_i32, %c0_i32_0 : i32, i32
  }
  func.func @transform_16(%arg0: i32) -> (i32, i32) {
    %c0_i32 = arith.constant 0 : i32
    %c0_i32_0 = arith.constant 0 : i32
    %c0_i32_1 = arith.constant 0 : i32
    return %c0_i32, %c0_i32_0 : i32, i32
  }
  func.func @transform_17(%arg0: i32) -> (i32, i32) {
    %c0_i32 = arith.constant 0 : i32
    %c0_i32_0 = arith.constant 0 : i32
    %c0_i32_1 = arith.constant 0 : i32
    return %c0_i32, %c0_i32_0 : i32, i32
  }
  func.func @transform_18(%arg0: i32) -> (i32, i32) {
    %c0_i32 = arith.constant 0 : i32
    %c0_i32_0 = arith.constant 0 : i32
    %c0_i32_1 = arith.constant 0 : i32
    return %c0_i32, %c0_i32_0 : i32, i32
  }
  func.func @transform_19(%arg0: i32) -> (i32, i32) {
    %c0_i32 = arith.constant 0 : i32
    %c0_i32_0 = arith.constant 0 : i32
    %c0_i32_1 = arith.constant 0 : i32
    return %c0_i32, %c0_i32_0 : i32, i32
  }
  func.func @transform_20(%arg0: i32) -> (i32, i32, i32) {
    %c0_i32 = arith.constant 0 : i32
    %c0_i32_0 = arith.constant 0 : i32
    %c0_i32_1 = arith.constant 0 : i32
    return %arg0, %c0_i32, %c0_i32_0 : i32, i32, i32
  }
}

</mosaic_0001>

<bundles_post_ra>
// kernel: tpu_custom_call.1
= control target key start
LH: loop header
LB: loop body
LE: loop exit
PB: predicated region body
PF: predicated region fallthrough
CT: control target
= control target key end

     0   :  { %s4541_s0 = inlined_call_operand.hbm [shape: f32[2,8,32], index: 0, kind: input, shape index: {}]   ;;  %s4542_s1 = inlined_call_operand.vmem [shape: f32[2,16,32], index: 1, kind: input, shape index: {}]   ;;  %s4543_s2 = inlined_call_operand.hbm [shape: f32[2,8,8], index: 2, kind: input, shape index: {}]   ;;  %s4544_s3 = inlined_call_operand.hbm [shape: f32[2,8,16], index: 3, kind: input, shape index: {}]   ;;  %s4545_s4 = inlined_call_operand.vmem [shape: f32[32,96], index: 4, kind: input, shape index: {}]   ;;  %s4546_s5 = inlined_call_operand.vmem [shape: f32[1,96], index: 5, kind: input, shape index: {}]   ;;  %s4547_s6 = inlined_call_operand.vmem [shape: f32[32,32], index: 6, kind: input, shape index: {}]   ;;  %s4548_s7 = inlined_call_operand.vmem [shape: f32[1,32], index: 7, kind: input, shape index: {}]   ;;  %s4549_s8 = inlined_call_operand.hbm [shape: f32[32,32], index: 8, kind: input, shape index: {}]   ;;  %s4550_s9 = inlined_call_operand.vmem [shape: f32[1,32], index: 9, kind: input, shape index: {}]   ;;  %s4551_s10 = inlined_call_operand.hbm [shape: f32[32,64], index: 10, kind: input, shape index: {}]   ;;  %s4552_s11 = inlined_call_operand.vmem [shape: f32[1,64], index: 11, kind: input, shape index: {}]   ;;  %s4553_s12 = inlined_call_operand.hbm [shape: f32[32,32], index: 12, kind: input, shape index: {}]   ;;  %s4554_s13 = inlined_call_operand.vmem [shape: f32[1,32], index: 13, kind: input, shape index: {}]   ;;  %s4555_s14 = inlined_call_operand.hbm [shape: f32[32,64], index: 14, kind: input, shape index: {}]   ;;  %s4556_s15 = inlined_call_operand.vmem [shape: f32[1,64], index: 15, kind: input, shape index: {}]   ;;  %s4557_s16 = inlined_call_operand.vmem [shape: f32[64,32], index: 16, kind: input, shape index: {}]   ;;  %s4558_s17 = inlined_call_operand.vmem [shape: f32[1,32], index: 17, kind: input, shape index: {}]   ;;  %s4559_s18 = inlined_call_operand.vmem [shape: f32[3,32], index: 18, kind: input, shape index: {}]   ;;  %s4560_s19 = inlined_call_operand.vmem [shape: f32[3,32], index: 19, kind: input, shape index: {}]   ;;  %s4561_s20 = inlined_call_operand.hbm [shape: f32[2,8,32], index: 20, kind: output, shape index: {}]  }
   0x1   :  { %4591 = sst [smem:[#allocation26_spill]] %s4541_s0 }
   0x2   :  { %4592 = sst [smem:[#allocation27_spill]] %s4542_s1 }
   0x3   :  { %4593 = sst [smem:[#allocation28_spill]] %s4543_s2 }
   0x4   :  { %4594 = sst [smem:[#allocation29_spill]] %s4544_s3 }
   0x5   :  { %4595 = sst [smem:[#allocation30_spill]] %s4545_s4 }
   0x6   :  { %4596 = sst [smem:[#allocation31_spill]] %s4549_s8 }
   0x7   :  { %4597 = sst [smem:[#allocation32_spill]] %s4550_s9 }
   0x8   :  { %4598 = sst [smem:[#allocation33_spill]] %s4551_s10 }
   0x9   :  { %4599 = sst [smem:[#allocation34_spill]] %s4553_s12 }
   0xa   :  { %4600 = sst [smem:[#allocation35_spill]] %s4554_s13 }
   0xb   :  { %4601 = sst [smem:[#allocation36_spill]] %s4555_s14 }
   0xc   :  { %4602 = sst [smem:[#allocation37_spill]] %s4556_s15 }
   0xd   :  { %4603 = sst [smem:[#allocation38_spill]] %s4557_s16 }
   0xe   :  { %4604 = sst [smem:[#allocation39_spill]] %s4558_s17 }
   0xf   :  { %4605 = sst [smem:[#allocation40_spill]] %s4561_s20 }
  0x10   :  { %25 = vsyncpa [#allocation3], 0 }
  0x11   :  { %27 = vsyncpa [#allocation3 + $0x1], 0 }
  0x12   :  { %28 = vsyncpa [#allocation6], 0 }
  0x13   :  { %30 = vsyncpa [#allocation6 + $0x1], 0 }
  0x14   :  { %31 = vsyncpa [#allocation9], 0 }
  0x15   :  { %32 = vsyncpa [#allocation12], 0 }
  0x16   :  { %33 = vsyncpa [#allocation4], 0 }
  0x17   :  { %35 = vsyncpa [#allocation4 + $0x1], 0  ;;  %s3918_s1 = smov 0   ;;  %s3920_s22 = smov 0  }
  0x18   :  { %s3922_s23 = smov 0   ;;  %s3924_s24 = smov 0  }
  0x19 LB: > { %4606 = sst [smem:[#allocation20_spill]] %s3778_s1  ;;  %s3792_s2 = smov [#allocation8]   ;;  %s3790_s24 = sphi %s3924_s24, %s4654_s24   ;;  %s3786_s23 = sphi %s3922_s23, %s4658_s23   ;;  %s3782_s22 = sphi %s3920_s22, %s4657_s22   ;;  %s3778_s1 = sphi %s3918_s1, %s4656_s1  }
  0x1a   : > { %4607 = sst [smem:[#allocation21_spill]] %s3790_s24  ;;  %s536_s25 = sshll.u32 %s3792_s2, 4  ;;  %s537_s25 = int_to_ptr.vmem [resolvable:$true] %s536_s25 }
  0x1b   : > { %s3939_s3 = sadd.s32 4294967295, %s3790_s24   ;;  %p3046_p0 = scmp.ge.s32.totalorder %s3790_s24, 1 }
  0x1c   : > { %p4581_p1 = scmp.eq.s32.totalorder %s3939_s3, 0  ;;  %p512_p2 = scmp.lt.s32.totalorder %s3790_s24, 3 }
  0x1d   : > { %s3793_s27 = smov [#allocation11]   ;;  %s3537_s29 = scalar_lea.vmem %s537_s25, 512 }
  0x1e   : > { %p3944_p3 = pnand %p3046_p0, %p512_p2  ;;  %s568_s28 = sshll.u32 %s3793_s27, 4  ;;  %s569_s28 = int_to_ptr.vmem [resolvable:$true] %s568_s28 }
  0x1f   : > { %p3538_p8 = scmp.ne.s32.totalorder %s537_s25, %s3537_s29  ;;  %p3545_p11 = scmp.lt.s32.totalorder %s537_s25, %s537_s25 }
  0x20   : > { %s4608_s26 = scalar_select %p3944_p3, 1, 0 }
  0x21   : > { %p3402_p5 = pneg %p3944_p3  ;;  %p3546_p12 = scmp.lt.s32.totalorder %s3537_s29, %s3537_s29 }
  0x23   : > { %p3953_p6 = pnand %p3402_p5, %p4581_p1  ;;  %p3547_p13 = por %p3546_p12, %p3545_p11 }
  0x25   : > { %s4609_s4 = scalar_select %p3953_p6, 1, 0 }
  0x26   : > { %p4569_p7 = pneg %p3953_p6 }
  0x28   : > { %p3540_p9 = pnand %p3538_p8, %p4569_p7 }
  0x2a   : > { %p3541_p10 = pneg %p3540_p9 }
  0x2c   : > { %p3548_p0 = pnand %p3547_p13, %p3541_p10 }
  0x2e   : > { %3551 = shalt.err (!%p3548_p0)
}
  0x2f   : > { %s4567_s30 = smov 128   ;;  %s4570_s0 = smov 8  }
  0x30   : > { %s4610_s8 = sld [smem:[#allocation31_spill]]  ;;  %s3563_s27 = scalar_lea.vmem %s569_s28, 512 }
  0x31   : > { %p3564_p2 = scmp.ne.s32.totalorder %s569_s28, %s3563_s27  ;;  %p3571_p9 = scmp.lt.s32.totalorder %s569_s28, %s569_s28 }
  0x32   : > { %p3572_p10 = scmp.lt.s32.totalorder %s3563_s27, %s3563_s27 }
  0x33   : > { %p3566_p5 = pnand %p3564_p2, %p4569_p7 }
  0x34   : > { %p3573_p11 = por %p3572_p10, %p3571_p9 }
  0x35   : > { %p3567_p8 = pneg %p3566_p5 }
  0x36   : > { %3405 = dma.hbm_to_vmem [thread:$0]  (!%p3953_p6), %s4610_s8, 512, %s537_s25, [#allocation9], %s4567_s30, %s4567_s30, %s4570_s0  }
  0x37   : > { %p3574_p12 = pnand %p3573_p11, %p3567_p8 }
  0x39   : > { %3577 = shalt.err (!%p3574_p12)
}
  0x3a   : > { %s4611_s12 = sld [smem:[#allocation34_spill]]  ;;  %s3045_s25 = sadd.s32 4294967294, %s3790_s24  }
  0x3b   : > { %s3983_s21 = sadd.s32 1, %s3790_s24   ;;  %s48_s2 = sadd.s32 1, %s3786_s23 }
  0x3c   : > { %4612 = sst [smem:[#allocation22_spill]] %s3983_s21  ;;  %s45_s20 = ssub.s32 %s3790_s24, %s3983_s21 }
  0x3d   : > { %p46_p13 = scmp.eq.s32.totalorder %s45_s20, 0  ;;  %p55_p0 = scmp.ne.s32.totalorder %s3786_s23, %s3782_s22 }
  0x3e   : > { %p56_p2 = scmp.eq.s32.totalorder %s3790_s24, 0  ;;  %p61_p5 = scmp.ne.s32.totalorder %s3782_s22, %s3778_s1 }
  0x3f   : > { %s3994_s27 = scalar_select %p46_p13, %s3786_s23, %s48_s2  }
  0x40   : > { %3411 = dma.hbm_to_vmem [thread:$0]  (!%p3953_p6), %s4611_s12, 512, %s569_s28, [#allocation12], %s4567_s30, %s4567_s30, %s4570_s0  }
  0x41   : > { %4613 = sst [smem:[#allocation23_spill]] %s3994_s27  ;;  %p57_p8 = por %p56_p2, %p55_p0 }
  0x42   : > { %p3998_p9 = por %p4581_p1, %p61_p5  ;;  %p499_p10 = scmp.eq.s32.totalorder %s3939_s3, 1 }
  0x43   : > { %p505_p11 = scmp.eq.s32.totalorder %s3045_s25, 1  ;;  %p3433_p12 = scmp.lt.s32.totalorder %s3790_s24, 2 }
  0x44   : > { %s4614_s29 = scalar_select %p3998_p9, 1, 0 }
  0x45   : > { %s4575_s28 = sand.u32 1, %s3786_s23   ;;  %p4005_p4 = por %p499_p10, %p55_p0 }
  0x46   : > { %p4009_p7 = por %p505_p11, %p61_p5  ;;  %s4015_s2 = sshll.u32 %s4575_s28, 3 }
  0x47   : > { %s4615_s30 = scalar_select %p4005_p4, 1, 0 }
  0x48   : > { %s4617_s20 = scalar_select %p4009_p7, 1, 0 }
  0x49   : > { %4616 = sst [smem:[#allocation24_spill]] %s4615_s30  ;;  %s4018_s0 = sshll.u32 %s3790_s24, 7 }
  0x4a   : > { %4618 = sst [smem:[#allocation25_spill]] %s4617_s20  ;;  %p4020_p13 = pnand %p3433_p12, %p57_p8 }
  0x4b   : > { %s639_s25 = sand.u32 1, %s3790_s24   ;;  %s4620_s21 = sld [smem:[#allocation28_spill]] }
  0x4c   : > { %s643_s28 = scalar_lea.vmem [#allocation5], %s4015_s2  ;;  %s3796_s30 = smov [#allocation10]  }
  0x4d   : > { %s650_s20 = sshll.u32 %s643_s28, 4  ;;  %s552_s17 = sshll.u32 %s3796_s30, 4  ;;  %s4032_s20 = int_to_ptr.vmem [resolvable:$true] %s650_s20  ;;  %s553_s17 = int_to_ptr.vmem [resolvable:$true] %s552_s17 }
  0x4e   : > { %s4034_s15 = scalar_lea.sflag [#allocation6], %s639_s25  ;;  %p4040_p2 = pneg %p4020_p13 }
  0x50   : > { %s4621_s24 = scalar_select %p4040_p2, 1, 0 }
  0x51   : > { %s4029_s1 = scalar_lea.hbm %s4620_s21, %s4018_s0  ;;  %s3583_s28 = scalar_lea.hbm %s4620_s21, 256 }
  0x52   : > { %s3578_s16 = scalar_lea.hbm %s4029_s1, 128  ;;  %p3584_p10 = scmp.lt.s32.totalorder %s4029_s1, %s4620_s21 }
  0x53   : > { %p3579_p0 = scmp.ne.s32.totalorder %s4029_s1, %s3578_s16  ;;  %p3585_p11 = scmp.lt.s32.totalorder %s3583_s28, %s3578_s16 }
  0x55   : > { %p3581_p5 = pnand %p4040_p2, %p3579_p0  ;;  %p3586_p12 = por %p3585_p11, %p3584_p10 }
  0x57   : > { %p3582_p8 = pneg %p3581_p5 }
  0x59   : > { %p3587_p1 = pnand %p3586_p12, %p3582_p8 }
  0x5b   : > { %3590 = shalt.err (!%p3587_p1)
}
  0x5c   : > { %s3591_s30 = scalar_lea.vmem %s4032_s20, 128  ;;  %s3797_s25 = smov [#allocation5]  }
  0x5d   : > { %p3592_p7 = scmp.ne.s32.totalorder %s4032_s20, %s3591_s30  ;;  %s3596_s12 = sshll.u32 %s3797_s25, 4  ;;  %s3597_s12 = int_to_ptr.vmem [resolvable:$false] %s3596_s12 }
  0x5e   : > { %s3598_s27 = scalar_lea.vmem %s3597_s12, 256  ;;  %p3599_p4 = scmp.lt.s32.totalorder %s4032_s20, %s3597_s12 }
  0x5f   : > { %p3594_p0 = pnand %p3592_p7, %p4040_p2  ;;  %p3600_p9 = scmp.lt.s32.totalorder %s3598_s27, %s3591_s30 }
  0x61   : > { %p3595_p5 = pneg %p3594_p0  ;;  %p3601_p3 = por %p3600_p9, %p3599_p4 }
  0x63   : > { %p3602_p6 = pnand %p3601_p3, %p3595_p5 }
  0x65   : > { %3605 = shalt.err (!%p3602_p6)
}
  0x66   : > { %3421 = dma.hbm_to_vmem [thread:$0]  (!%p4020_p13), %s4029_s1, 128, %s4032_s20, %s4034_s15  }
  0x67   : > { %s3617_s9 = scalar_lea.vmem %s553_s17, 512  ;;  %p4622_p7 = scmp.ne.s32.totalorder %s4609_s4, 0 }
  0x68   : > { %p3618_p1 = scmp.ne.s32.totalorder %s553_s17, %s3617_s9  ;;  %p3625_p12 = scmp.lt.s32.totalorder %s553_s17, %s553_s17 }
  0x69   : > { %p4623_p8 = pneg %p4622_p7  ;;  %p3626_p0 = scmp.lt.s32.totalorder %s3617_s9, %s3617_s9 }
  0x6b   : > { %p3620_p10 = pnand %p3618_p1, %p4623_p8  ;;  %p3627_p2 = por %p3626_p0, %p3625_p12 }
  0x6d   : > { %p3621_p11 = pneg %p3620_p10 }
  0x6f   : > { %p3628_p4 = pnand %p3627_p2, %p3621_p11 }
  0x71   : > { %3631 = shalt.err (!%p3628_p4)
}
  0x72   : > { %s4624_s13 = smov 8   ;;  %s4625_s16 = smov 128  }
  0x73   : > { %s4626_s10 = sld [smem:[#allocation33_spill]]  ;;  %s3798_s1 = smov [#allocation13]  }
  0x74   : > { %s584_s20 = sshll.u32 %s3798_s1, 4  ;;  %p4627_p6 = pmov %p4623_p8  ;;  %s585_s20 = int_to_ptr.vmem [resolvable:$true] %s584_s20 }
  0x75   : > { %s3643_s25 = scalar_lea.vmem %s585_s20, 512  ;;  %p3651_p5 = scmp.lt.s32.totalorder %s585_s20, %s585_s20 }
  0x76   : > { %p3644_p3 = scmp.ne.s32.totalorder %s585_s20, %s3643_s25  ;;  %p3652_p1 = scmp.lt.s32.totalorder %s3643_s25, %s3643_s25 }
  0x78   : > { %p3646_p9 = pnand %p3644_p3, %p4627_p6  ;;  %p3653_p8 = por %p3652_p1, %p3651_p5 }
  0x79   : > { %3408 = dma.hbm_to_vmem [thread:$0]  (!%p4622_p7), %s4626_s10, 512, %s553_s17, [#allocation9], %s4625_s16, %s4625_s16, %s4624_s13  }
  0x7a   : > { %p3647_p2 = pneg %p3646_p9 }
  0x7c   : > { %p3654_p10 = pnand %p3653_p8, %p3647_p2 }
  0x7e   : > { %3657 = shalt.err (!%p3654_p10)
}
  0x7f   : > { %s4628_s14 = sld [smem:[#allocation36_spill]]  ;;  %s617_s4 = scalar_lea.vmem [#allocation2], %s4015_s2 }
  0x80   : > { %s4629_s28 = sld [smem:[#allocation26_spill]]  ;;  %s624_s1 = sshll.u32 %s617_s4, 4  ;;  %s625_s1 = int_to_ptr.vmem [resolvable:$true] %s624_s1 }
  0x81   : > { %s4630_s25 = sand.u32 1, %s3786_s23   ;;  %p4631_p12 = scmp.ne.s32.totalorder %s4621_s24, 0 }
  0x82   : > { %s614_s10 = scalar_lea.sflag [#allocation3], %s4630_s25 }
  0x85   : > { %3414 = dma.hbm_to_vmem [thread:$0]  (!%p4622_p7), %s4628_s14, 512, %s585_s20, [#allocation12], %s4625_s16, %s4625_s16, %s4624_s13  }
  0x86   : > { %s4089_s30 = scalar_lea.hbm %s4629_s28, %s4018_s0  ;;  %s3663_s16 = scalar_lea.hbm %s4629_s28, 256 }
  0x87   : > { %s3658_s21 = scalar_lea.hbm %s4089_s30, 128  ;;  %p3664_p7 = scmp.lt.s32.totalorder %s4089_s30, %s4629_s28 }
  0x88   : > { %p3659_p11 = scmp.ne.s32.totalorder %s4089_s30, %s3658_s21  ;;  %p3665_p3 = scmp.lt.s32.totalorder %s3663_s16, %s3658_s21 }
  0x8a   : > { %p3661_p0 = pnand %p3659_p11, %p4631_p12  ;;  %p3666_p6 = por %p3665_p3, %p3664_p7 }
  0x8c   : > { %p3662_p4 = pneg %p3661_p0 }
  0x8e   : > { %p3667_p9 = pnand %p3666_p6, %p3662_p4 }
  0x90   : > { %3670 = shalt.err (!%p3667_p9)
}
  0x91   : > { %s3671_s27 = scalar_lea.vmem %s625_s1, 128  ;;  %s3799_s9 = smov [#allocation2]  }
  0x92   : > { %p3672_p2 = scmp.ne.s32.totalorder %s625_s1, %s3671_s27  ;;  %s3676_s4 = sshll.u32 %s3799_s9, 4  ;;  %s3677_s4 = int_to_ptr.vmem [resolvable:$false] %s3676_s4 }
  0x93   : > { %s3678_s25 = scalar_lea.vmem %s3677_s4, 256  ;;  %p3679_p8 = scmp.lt.s32.totalorder %s625_s1, %s3677_s4 }
  0x94   : > { %p3674_p5 = pnand %p3672_p2, %p4631_p12  ;;  %p3680_p10 = scmp.lt.s32.totalorder %s3678_s25, %s3671_s27 }
  0x96   : > { %p3675_p1 = pneg %p3674_p5  ;;  %p3681_p11 = por %p3680_p10, %p3679_p8 }
  0x98   : > { %p3682_p0 = pnand %p3681_p11, %p3675_p1 }
  0x9a   : > { %3685 = shalt.err (!%p3682_p0)
}
  0x9b   : > { %3418 = dma.hbm_to_vmem [thread:$0]  (!%p4020_p13), %s4089_s30, 128, %s625_s1, %s614_s10  }
  0x9c   : > { %s4632_s13 = sld [smem:[#allocation29_spill]]  ;;  %s661_s20 = scalar_lea.vmem [#allocation7], %s4015_s2 }
  0x9d   : > { %s668_s12 = sshll.u32 %s661_s20, 4  ;;  %s669_s12 = int_to_ptr.vmem [resolvable:$true] %s668_s12 }
  0xa2   : > { %s666_s16 = scalar_lea.hbm %s4632_s13, %s4018_s0  ;;  %s3691_s25 = scalar_lea.hbm %s4632_s13, 256 }
  0xa3   : > { %s3686_s9 = scalar_lea.hbm %s666_s16, 128  ;;  %p3692_p6 = scmp.lt.s32.totalorder %s666_s16, %s4632_s13 }
  0xa4   : > { %p3687_p4 = scmp.ne.s32.totalorder %s666_s16, %s3686_s9  ;;  %p3693_p9 = scmp.lt.s32.totalorder %s3691_s25, %s3686_s9 }
  0xa6   : > { %p3689_p7 = pnand %p3687_p4, %p4631_p12  ;;  %p3694_p2 = por %p3693_p9, %p3692_p6 }
  0xa8   : > { %p3690_p3 = pneg %p3689_p7 }
  0xaa   : > { %p3695_p5 = pnand %p3694_p2, %p3690_p3 }
  0xac   : > { %3698 = shalt.err (!%p3695_p5)
}
  0xad   : > { %s3699_s10 = scalar_lea.vmem %s669_s12, 128  ;;  %s3800_s0 = smov [#allocation7]  }
  0xae   : > { %p3700_p1 = scmp.ne.s32.totalorder %s669_s12, %s3699_s10  ;;  %s3704_s2 = sshll.u32 %s3800_s0, 4  ;;  %s3705_s2 = int_to_ptr.vmem [resolvable:$false] %s3704_s2 }
  0xaf   : > { %s3706_s30 = scalar_lea.vmem %s3705_s2, 256  ;;  %p3707_p11 = scmp.lt.s32.totalorder %s669_s12, %s3705_s2 }
  0xb0   : > { %p3702_p8 = pnand %p3700_p1, %p4631_p12  ;;  %p3708_p0 = scmp.lt.s32.totalorder %s3706_s30, %s3699_s10 }
  0xb2   : > { %p3703_p10 = pneg %p3702_p8  ;;  %p3709_p4 = por %p3708_p0, %p3707_p11 }
  0xb4   : > { %p3710_p7 = pnand %p3709_p4, %p3703_p10 }
  0xb6   : > { %3713 = shalt.err (!%p3710_p7)
}
  0xb7   : > { %3424 = dma.hbm_to_vmem [thread:$0]  (!%p4020_p13), %s666_s16, 128, %s669_s12, %s4034_s15  }
  0xb8   : > { %p4633_p3 = scmp.ne.s32.totalorder %s4608_s26, 0 }
  0xb9   : > { %s4131_s14 = sand.u32 (!%p4633_p3), 1, %s3782_s22   ;;  %p4634_p12 = scmp.ne.s32.totalorder (!%p4633_p3), %s4614_s29, 0 }
  0xba   : > { %677 = sbr.rel (%p4633_p3) target bundleno = 4334 (0x10ee), region = 100  ;;  %s4134_s24 = sshll.u32 (!%p4633_p3), %s4131_s14, 3 }
  0xbb   : > { %s680_s28 = scalar_lea.sflag (!%p4633_p3), [#allocation3], %s4131_s14  ;;  %s683_s1 = scalar_lea.vmem (!%p4633_p3), [#allocation2], %s4134_s24 }
  0xbf   : > { %3757 = dma.done.wait (%p4634_p12), %s680_s28, 128  }
  0xc0   : > { %3759 = vsyncadd (%p4634_p12), %s680_s28, 4294967168  ;;  %s688_s8 = sand.u32 1, %s3939_s3   ;;  %s692_s26 = scalar_lea.vmem [#allocation5], %s4134_s24 }
  0xc1   : > { %s689_s15 = scalar_lea.sflag [#allocation6], %s688_s8 }
  0xc2   : > { %3761 = dma.done.wait (%p4634_p12), %s689_s15, 256  }
  0xc3   : > { %3763 = vsyncadd (%p4634_p12), %s689_s15, 4294967040  ;;  %s701_s21 = scalar_lea.vmem [#allocation7], %s4134_s24  ;;  %p4635_p13 = scmp.eq.s32.totalorder %s3939_s3, 0 }
  0xc5   : > { %3765 = dma.done.wait (%p4635_p13), [#allocation9], 1024   ;;  %p4636_p6 = pmov %p4635_p13 }
  0xc7   : > { %3767 = vsyncadd (%p4636_p6), [#allocation9], 4294966272  ;;  %p4637_p9 = pmov %p4636_p6 }
  0xc8   : > { %p4638_p2 = pmov %p4636_p6 }
  0xc9   : > { %3769 = dma.done.wait (%p4637_p9), [#allocation12], 1024  }
  0xca   : > { %3771 = vsyncadd (%p4638_p2), [#allocation12], 4294966272  ;;  %v3801_v0 = vmov 0.0   ;;  %vm3802_vm0 = vmmov 0   ;;  %s4639_s16 = sld [smem:[#allocation30_spill]]  ;;  %v4177_v5 = vld [vmem:[%s683_s1] sm:$0xff] }
  0xcb   : > { %3197 = vmatprep.subr.mxu1 %v3801_v0  ;;  %3205 = vmatprep.mubr.msk.f32.mxu1 %vm3802_vm0, %v3801_v0  ;;  %vm816_vm1 = vcmask 261120   ;;  %v3069_v6 = vld [vmem:[%s4546_s5] ss:$0 sm:$0xff]  ;;  %s3803_s2 = smov 104   ;;  %s3804_s30 = smov 120   ;;  %vm912_vm2 = vcmask 64512  }
  0xcc   : > { %3218 = vmatprep.subr.mxu0 %v3801_v0  ;;  %3220 = vmatprep.mubr.msk.f32.mxu0 %vm3802_vm0, %v3801_v0  ;;  %s3805_s28 = smov 96   ;;  %s3806_s1 = smov 112   ;;  %v799_v21 = vld [vmem:[%s692_s26] sm:$0xff]  ;;  %v3807_v22 = vmov -1e+09   ;;  %vm1576_vm4 = vcmask 130048  }
  0xcd   : > { %vm800_vm3 = vcmp.gt.f32.partialorder %v799_v21, 0.0  ;;  %s3808_s8 = smov 64   ;;  %s3809_s4 = smov 8   ;;  %vm1578_vm5 = vcmask 195584   ;;  %vm2769_vm7 = vcmask 523264  }
  0xce   : > { %v801_v23 = vsel %vm800_vm3, 0.0, %v3807_v22  ;;  %s3810_s25 = smov 16   ;;  %s3811_s10 = smov 24  }
  0xcf   : > { %p789_p5 = scmp.lt.s32.totalorder %s3939_s3, 1  ;;  %s4640_s20 = sld [smem:[#allocation27_spill]] }
  0xd0   : > { %v808_v1 = vld [vmem:[%s4639_s16 + $0x18] sm:$0xff]  ;;  %v807_v2 = vld [vmem:[%s4639_s16 + $0x10] sm:$0xff]  ;;  %v806_v3 = vld [vmem:[%s4639_s16 + $0x8] sm:$0xff]  ;;  %s4646_s9 = sld [smem:[#allocation24_spill]]  ;;  %s3113_s27 = sshll.u32 %s3939_s3, 7 }
  0xd1   : > { %3198 = vmatpush3.msra.mxu1 %v808_v1  ;;  %v805_v4 = vld [vmem:[%s4639_s16] sm:$0xff]  ;;  %s790_s15 = scalar_select %p789_p5, %s3939_s3, 1 }
  0xd2   : > { %3199 = vmatprep.subr.mxu1 %v3801_v0  ;;  %s788_s0 = scalar_lea.vmem [#allocation14], %s4134_s24  ;;  %s4647_s29 = sld [smem:[#allocation40_spill]] }
  0xd3   : > { %3200 = vmatpush3.msra.mxu1 %v807_v2  ;;  %s3116_s26 = sshll.u32 %s790_s15, 4 }
  0xd4   : > { %3201 = vmatprep.subr.mxu1 %v3801_v0 }
  0xd5   : > { %3202 = vmatpush3.msra.mxu1 %v806_v3  ;;  %s793_s12 = scalar_lea.vmem %s4640_s20, %s3116_s26  ;;  %s4641_s20 = sld [smem:[#allocation32_spill]] }
  0xd6   : > { %3203 = vmatprep.subr.mxu1 %v3801_v0  ;;  %p4648_p8 = scmp.ne.s32.totalorder %s4646_s9, 0 }
  0xd7   : > { %3204 = vmatpush3.msra.mxu1 %v805_v4 }
  0xd8   : > { %3206 = vmatmul.mubr.msk.f32.vlgmr.msra.gmra.mxu1 %vm816_vm1, %v4177_v5  ;;  %3208 = vmatprep.subr.mxu1 %v3801_v0  ;;  %s2880_s17 = scalar_lea.hbm %s4647_s29, %s3113_s27 }
  0xd9   : > { %3210 = vmatprep.mubr.msk.f32.mxu1 %vm3802_vm0, %v3801_v0 }
 0x198   : > { %v886_v7 = vpop.f32.mrf.mxu1 }
 0x199   : > { %v4188_v8 = vadd.f32 %v3069_v6, %v886_v7 }
 0x19a   : > { %v3207_v9 = vpop.f32.mrf.mxu1 }
 0x19b   : > { %908 = vrot.lane.b32.xlu1 %v4188_v8, %s3803_s2  ;;  %904 = vrot.lane.b32.xlu0 %v4188_v8, %s3804_s30  ;;  %v890_v10 = vmul.f32 0.35355338, %v4188_v8 }
 0x19f   : > { %910 = vrot.lane.b32.xlu1 %v4188_v8, %s3805_s28  ;;  %906 = vrot.lane.b32.xlu0 %v4188_v8, %s3806_s1 }
 0x1a3   : > { %897 = vrot.lane.b32.xlu1 %v890_v10, %s3804_s30 }
 0x20d   : > { %v4200_v11 = vpop.permute.xlu1 %908  ;;  %v4202_v12 = vpop.permute.xlu0 %904 }
 0x20e   : > { %987 = vrot.lane.b32.xlu0 %v4202_v12, %s3805_s28  ;;  %1139 = vrot.lane.b32.xlu1 %v4200_v11, %s3805_s28 }
 0x211   : > { %v911_v13 = vpop.permute.xlu1 %910  ;;  %v4208_v14 = vpop.permute.xlu0 %906 }
 0x212   : > { %3209 = vmatpush3.xpose.msk.msra.mxu1 %vm912_vm2, %v911_v13  ;;  %1063 = vrot.lane.b32.xlu0 %v4208_v14, %s3805_s28 }
 0x213   : > { %901 = vrot.lane.b32.xlu1 %v890_v10, %s3803_s2  ;;  %3213 = vmatprep.subr.mxu1 %v3801_v0 }
 0x215   : > { %3211 = vmatmul.mubr.msk.f32.vlgmr.msra.gmra.mxu1 %vm912_vm2, %v890_v10  ;;  %v898_v15 = vpop.permute.xlu1 %897 }
 0x216   : > { %899 = vrot.lane.b32.xlu0 %v890_v10, %s3806_s1  ;;  %3215 = vmatprep.mubr.msk.f32.mxu1 %vm3802_vm0, %v3801_v0 }
 0x280   : > { %v988_v16 = vpop.permute.xlu0 %987  ;;  %v1140_v17 = vpop.permute.xlu1 %1139 }
 0x281   : > { %3214 = vmatpush3.xpose.msk.msra.mxu1 %vm912_vm2, %v988_v16  ;;  %v894_v16 = vld [vmem:[%s4547_s6 + $0x18] sm:$0xff] }
 0x282   : > { %3223 = vmatprep.subr.mxu1 %v3801_v0 }
 0x284   : > { %v1064_v18 = vpop.permute.xlu0 %1063  ;;  %3216 = vmatmul.mubr.msk.f32.vlgmr.msra.gmra.mxu1 %vm912_vm2, %v898_v15 }
 0x285   : > { %3219 = vmatpush3.xpose.msk.msra.mxu0 %vm912_vm2, %v1064_v18  ;;  %3224 = vmatpush3.xpose.msk.msra.mxu1 %vm912_vm2, %v1140_v17  ;;  %v902_v19 = vpop.permute.xlu1 %901  ;;  %v893_v17 = vld [vmem:[%s4547_s6 + $0x10] sm:$0xff]  ;;  %v892_v18 = vld [vmem:[%s4547_s6 + $0x8] sm:$0xff] }
 0x286   : > { %3225 = vmatprep.mubr.msk.f32.mxu1 %vm3802_vm0, %v3801_v0  ;;  %3228 = vmatprep.subr.mxu0 %v3801_v0 }
 0x287   : > { %3233 = vmatprep.subr.mxu1 %v3801_v0 }
 0x288   : > { %v900_v20 = vpop.permute.xlu0 %899  ;;  %3226 = vmatmul.mubr.msk.f32.vlgmr.msra.gmra.mxu1 %vm912_vm2, %v902_v19  ;;  %v891_v19 = vld [vmem:[%s4547_s6] sm:$0xff] }
 0x289   : > { %3221 = vmatmul.mubr.msk.f32.vlgmr.msra.gmra.mxu0 %vm912_vm2, %v900_v20  ;;  %3235 = vmatprep.mubr.msk.f32.mxu1 %vm3802_vm0, %v3801_v0 }
 0x28a   : > { %3230 = vmatprep.mubr.msk.f32.mxu0 %vm3802_vm0, %v3801_v0 }
 0x2d5   : > { %v983_v24 = vpop.f32.mrf.mxu1 }
 0x2d6   : > { %v984_v25 = vadd.f32 %v983_v24, %v801_v23 }
 0x2d7   : > { %v3212_v26 = vpop.f32.mrf.mxu1 }
 0x2d8   : > { %v1215_v27 = vsel %vm912_vm2, %v984_v25, -inf }
 0x2d9   : > { %1216 = vmax.xlane.f32.xlu0 %v1215_v27 }
 0x344   : > { %v1059_v28 = vpop.f32.mrf.mxu1 }
 0x345   : > { %v1060_v29 = vadd.f32 %v1059_v28, %v801_v23 }
 0x346   : > { %v3217_v30 = vpop.f32.mrf.mxu1 }
 0x347   : > { %v1218_v31 = vsel %vm912_vm2, %v1060_v29, -inf }
 0x348   : > { %1219 = vmax.xlane.f32.xlu1 %v1218_v31  ;;  %v1211_v32 = vpop.f32.mrf.mxu1 }
 0x349   : > { %v1135_v33 = vpop.f32.mrf.mxu0  ;;  %v1212_v37 = vadd.f32 %v1211_v32, %v801_v23 }
 0x34a   : > { %v1136_v34 = vadd.f32 %v1135_v33, %v801_v23  ;;  %v3227_v35 = vpop.f32.mrf.mxu1  ;;  %v3083_v33 = vld [vmem:[%s4548_s7] ss:$0 sm:$0xff] }
 0x34b   : > { %v3222_v36 = vpop.f32.mrf.mxu0  ;;  %v1224_v39 = vsel %vm912_vm2, %v1212_v37, -inf }
 0x34c   : > { %v1221_v38 = vsel %vm912_vm2, %v1136_v34, -inf }
 0x34d   : > { %1222 = vmax.xlane.f32.xlu0 %v1221_v38 }
 0x351   : > { %1225 = vmax.xlane.f32.xlu0 %v1224_v39  ;;  %v1772_v39 = vld [vmem:[#allocation10 + $0x18] sm:$0xff] }
 0x359   : > { %1259 = vrot.lane.b32.xlu1 %v4188_v8, %s3808_s8 }
 0x362   : > { %v1217_v40 = vpop.xlane.xlu0 %1216 }
 0x363   : > { %v1227_v41 = vsub.f32 %v984_v25, %v1217_v40 }
 0x365   : > { %v1231_v42 = vmul.f32 1.442695, %v1227_v41 }
 0x367   : > { %3488 = vpow2.f32 %v1231_v42 }
 0x374   : > { %v3489_v43 = vpop.eup %3488 }
 0x375   : > { %v1239_v44 = vsel %vm912_vm2, %v3489_v43, 0.0 }
 0x37d   : > { %1240 = vadd.xlane.f32.xlu1 %v1239_v44 }
 0x3d1   : > { %v1220_v45 = vpop.xlane.xlu1 %1219 }
 0x3d2   : > { %v1228_v46 = vsub.f32 %v1060_v29, %v1220_v45  ;;  %v1771_v45 = vld [vmem:[#allocation10 + $0x10] sm:$0xff] }
 0x3d4   : > { %v1233_v47 = vmul.f32 1.442695, %v1228_v46  ;;  %v1770_v46 = vld [vmem:[#allocation10 + $0x8] sm:$0xff] }
 0x3d5   : > { %v1260_v48 = vpop.permute.xlu1 %1259 }
 0x3d6   : > { %3490 = vpow2.f32 %v1233_v47  ;;  %v1223_v49 = vpop.xlane.xlu0 %1222  ;;  %3229 = vmatpush3.msra.mxu0 %v1260_v48  ;;  %v795_v47 = vld [vmem:[%s793_s12] sm:$0xff]  ;;  %v796_v48 = vld [vmem:[%s793_s12 + $0x8] sm:$0xff]  ;;  %s4645_s12 = sld [smem:[#allocation39_spill]] }
 0x3d7   : > { %v1229_v50 = vsub.f32 %v1136_v34, %v1223_v49  ;;  %3238 = vmatprep.subr.mxu0 %v3801_v0  ;;  %v1687_v49 = vld [vmem:[#allocation8 + $0x18] sm:$0xff] }
 0x3d9   : > { %v1235_v51 = vmul.f32 1.442695, %v1229_v50  ;;  %v1686_v50 = vld [vmem:[#allocation8 + $0x10] sm:$0xff] }
 0x3da   : > { %v1226_v52 = vpop.xlane.xlu0 %1225 }
 0x3db   : > { %3492 = vpow2.f32 %v1235_v51  ;;  %v1230_v53 = vsub.f32 %v1212_v37, %v1226_v52  ;;  %v1685_v51 = vld [vmem:[#allocation8 + $0x8] sm:$0xff]  ;;  %v1684_v52 = vld [vmem:[#allocation8] sm:$0xff] }
 0x3dd   : > { %v1237_v54 = vmul.f32 1.442695, %v1230_v53 }
 0x3df   : > { %3494 = vpow2.f32 %v1237_v54 }
 0x3e3   : > { %v3491_v55 = vpop.eup %3490 }
 0x3e4   : > { %v1242_v56 = vsel %vm912_vm2, %v3491_v55, 0.0 }
 0x3e5   : > { %1243 = vadd.xlane.f32.xlu0 %v1242_v56  ;;  %v1674_v56 = vlaneseq }
 0x3e8   : > { %v3493_v57 = vpop.eup %3492 }
 0x3e9   : > { %v1245_v58 = vsel %vm912_vm2, %v3493_v57, 0.0 }
 0x3ea   : > { %1246 = vadd.xlane.f32.xlu1 %v1245_v58 }
 0x3ec   : > { %v3495_v59 = vpop.eup %3494 }
 0x3ed   : > { %v1248_v60 = vsel %vm912_vm2, %v3495_v59, 0.0 }
 0x3ee   : > { %1249 = vadd.xlane.f32.xlu0 %v1248_v60  ;;  %v4322_v60 = vld [vmem:[%s4560_s19] sm:$0x7] }
 0x3fb   : > { %1411 = vrot.lane.b32.xlu1 %v4208_v14, %s3808_s8 }
 0x3ff   : > { %1487 = vrot.lane.b32.xlu1 %v4200_v11, %s3808_s8 }
 0x404   : > { %1335 = vrot.lane.b32.xlu0 %v4202_v12, %s3808_s8  ;;  %s2882_s8 = sshll.u32 %s788_s0, 4  ;;  %s2883_s8 = int_to_ptr.vmem [resolvable:$true] %s2882_s8 }
 0x406   : > { %v1241_v61 = vpop.xlane.xlu1 %1240 }
 0x407   : > { %3496 = vrcp.f32 %v1241_v61 }
 0x414   : > { %v3497_v62 = vpop.eup %3496 }
 0x415   : > { %v1255_v63 = vmul.f32 %v3497_v62, %v3489_v43 }
 0x417   : > { %3231 = vmatmul.mubr.msk.f32.vlgmr.msra.gmra.mxu0 %vm912_vm2, %v1255_v63 }
 0x418   : > { %3240 = vmatprep.mubr.msk.f32.mxu0 %vm3802_vm0, %v3801_v0 }
 0x46e   : > { %v1244_v1 = vpop.xlane.xlu0 %1243 }
 0x46f   : > { %3498 = vrcp.f32 %v1244_v1 }
 0x473   : > { %v1247_v2 = vpop.xlane.xlu1 %1246 }
 0x474   : > { %3500 = vrcp.f32 %v1247_v2 }
 0x477   : > { %v1412_v3 = vpop.permute.xlu1 %1411  ;;  %v1250_v4 = vpop.xlane.xlu0 %1249 }
 0x478   : > { %3502 = vrcp.f32 %v1250_v4  ;;  %3239 = vmatpush3.msra.mxu0 %v1412_v3 }
 0x479   : > { %3248 = vmatprep.subr.mxu0 %v3801_v0 }
 0x47b   : > { %v1336_v6 = vpop.permute.xlu0 %1335  ;;  %v1488_v9 = vpop.permute.xlu1 %1487 }
 0x47c   : > { %v3499_v7 = vpop.eup %3498  ;;  %3234 = vmatpush3.msra.mxu1 %v1336_v6  ;;  %v3087_v6 = vld [vmem:[%s4552_s11] ss:$0 sm:$0xff] }
 0x47d   : > { %3243 = vmatprep.subr.mxu1 %v3801_v0  ;;  %v1256_v8 = vmul.f32 %v3499_v7, %v3491_v55 }
 0x47f   : > { %3236 = vmatmul.mubr.msk.f32.vlgmr.msra.gmra.mxu1 %vm912_vm2, %v1256_v8 }
 0x480   : > { %3244 = vmatpush3.msra.mxu1 %v1488_v9  ;;  %3245 = vmatprep.mubr.msk.f32.mxu1 %vm3802_vm0, %v3801_v0 }
 0x481   : > { %v3501_v10 = vpop.eup %3500  ;;  %3259 = vmatprep.subr.mxu1 %v3801_v0 }
 0x482   : > { %v1257_v11 = vmul.f32 %v3501_v10, %v3493_v57  ;;  %v4311_v57 = vshrl.u32 %v1674_v56, 7 }
 0x484   : > { %3241 = vmatmul.mubr.msk.f32.vlgmr.msra.gmra.mxu0 %vm912_vm2, %v1257_v11  ;;  %v1676_v58 = vsub.s32 0, %v4311_v57 }
 0x485   : > { %v3503_v12 = vpop.eup %3502  ;;  %3256 = vmatprep.mubr.msk.f32.mxu0 %vm3802_vm0, %v3801_v0  ;;  %3249 = vmatpush3.msra.mxu0 %v894_v16 }
 0x486   : > { %v1258_v13 = vmul.f32 %v3503_v12, %v3495_v59  ;;  %3250 = vmatprep.subr.mxu0 %v3801_v0  ;;  %v4317_v59 = vld [vmem:[%s4559_s18] sm:$0x7]  ;;  %v1682_v1 = vrot.slane %v4322_v60, %v1676_v58 }
 0x487   : > { %3251 = vmatpush3.msra.mxu0 %v893_v17  ;;  %v1677_v61 = vrot.slane %v4317_v59, %v1676_v58  ;;  %v3085_v12 = vld [vmem:[%s4641_s20] ss:$0 sm:$0xff]  ;;  %s2869_s20 = scalar_lea.sflag [#allocation4], %s4131_s14 }
 0x488   : > { %3246 = vmatmul.mubr.msk.f32.vlgmr.msra.gmra.mxu1 %vm912_vm2, %v1258_v13  ;;  %3252 = vmatprep.subr.mxu0 %v3801_v0 }
 0x489   : > { %3267 = vmatprep.mubr.msk.f32.mxu1 %vm3802_vm0, %v3801_v0  ;;  %3253 = vmatpush3.msra.mxu0 %v892_v18 }
 0x48a   : > { %3254 = vmatprep.subr.mxu0 %v3801_v0  ;;  %3260 = vmatpush3.msra.mxu1 %v1687_v49 }
 0x48b   : > { %3255 = vmatpush3.msra.mxu0 %v891_v19  ;;  %3261 = vmatprep.subr.mxu1 %v3801_v0 }
 0x48c   : > { %3270 = vmatprep.subr.mxu0 %v1772_v39  ;;  %3262 = vmatpush3.msra.mxu1 %v1686_v50 }
 0x48d   : > { %3263 = vmatprep.subr.mxu1 %v3801_v0 }
 0x48e   : > { %3264 = vmatpush3.msra.mxu1 %v1685_v51 }
 0x48f   : > { %3265 = vmatprep.subr.mxu1 %v3801_v0 }
 0x490   : > { %3266 = vmatpush3.msra.mxu1 %v1684_v52 }
 0x491   : > { %3281 = vmatprep.subr.mxu1 %v3801_v0 }
 0x4d7   : > { %v1331_v14 = vpop.f32.mrf.mxu0 }
 0x4d9   : > { %v3232_v15 = vpop.f32.mrf.mxu0 }
 0x53f   : > { %v1407_v20 = vpop.f32.mrf.mxu1 }
 0x540   : > { %1564 = vrot.lane.b32.xlu0 %v1407_v20, %s3809_s4 }
 0x541   : > { %v3237_v21 = vpop.f32.mrf.mxu1 }
 0x544   : > { %v1483_v23 = vpop.f32.mrf.mxu0 }
 0x545   : > { %1568 = vrot.lane.b32.xlu1 %v1483_v23, %s3810_s25 }
 0x546   : > { %v3242_v24 = vpop.f32.mrf.mxu0 }
 0x548   : > { %v1559_v25 = vpop.f32.mrf.mxu1 }
 0x549   : > { %1572 = vrot.lane.b32.xlu0 %v1559_v25, %s3811_s10  ;;  %v802_v25 = vld [vmem:[%s701_s21] sm:$0xff]  ;;  %s3714_s21 = scalar_lea.vmem %s2883_s8, 128 }
 0x54a   : > { %v3247_v26 = vpop.f32.mrf.mxu1  ;;  %vm803_vm6 = vcmp.gt.f32.partialorder %v802_v25, 0.0  ;;  %p3715_p1 = scmp.ne.s32.totalorder %s2883_s8, %s3714_s21 }
 0x54b   : > { %v804_v26 = vsel %vm803_vm6, 0.0, %v3807_v22 }
 0x54c   : > { %p3716_p10 = pnand %p3715_p1, %p4648_p8 }
 0x54e   : > { %p3717_p11 = pneg %p3716_p10 }
 0x5b2   : > { %v1565_v27 = vpop.permute.xlu0 %1564 }
 0x5b3   : > { %v1575_v29 = vsel %vm912_vm2, %v1331_v14, %v1565_v27 }
 0x5b7   : > { %v1569_v28 = vpop.permute.xlu1 %1568 }
 0x5b8   : > { %v1577_v30 = vsel %vm1576_vm4, %v1575_v29, %v1569_v28 }
 0x5bb   : > { %v1573_v31 = vpop.permute.xlu0 %1572 }
 0x5bc   : > { %v1579_v32 = vsel %vm1578_vm5, %v1577_v30, %v1573_v31 }
 0x5bd   : > { %3257 = vmatmul.mubr.msk.f32.vlgmr.msra.gmra.mxu0 %vm816_vm1, %v1579_v32 }
 0x5be   : > { %3271 = vmatpush3.msra.mxu0 %v1772_v39  ;;  %3278 = vmatprep.mubr.msk.f32.mxu0 %vm816_vm1, %v795_v47 }
 0x5bf   : > { %3272 = vmatprep.subr.mxu0 %v1771_v45 }
 0x5c0   : > { %3273 = vmatpush3.msra.mxu0 %v1771_v45 }
 0x5c1   : > { %3274 = vmatprep.subr.mxu0 %v1770_v46 }
 0x5c2   : > { %3275 = vmatpush3.msra.mxu0 %v1770_v46 }
 0x67d   : > { %v1655_v34 = vpop.f32.mrf.mxu0 }
 0x67e   : > { %v1656_v35 = vadd.f32 %v3083_v33, %v1655_v34 }
 0x67f   : > { %v3258_v36 = vpop.f32.mrf.mxu0 }
 0x680   : > { %v1659_v37 = vadd.f32 %v1656_v35, %v4177_v5  ;;  %v1769_v5 = vld [vmem:[#allocation10] sm:$0xff] }
 0x681   : > { %3276 = vmatprep.subr.mxu0 %v1769_v5 }
 0x682   : > { %v1660_v38 = vsel %vm816_vm1, %v1659_v37, 0.0  ;;  %3277 = vmatpush3.msra.mxu0 %v1769_v5 }
 0x683   : > { %1661 = vadd.xlane.f32.xlu1 %v1660_v38  ;;  %3279 = vmatmul.mubr.msk.f32.vlgmr.msra.gmra.mxu0 %vm816_vm1, %v796_v48 }
 0x684   : > { %3288 = vmatprep.subr.mxu0 %v3801_v0  ;;  %3292 = vmatprep.mubr.msk.f32.mxu0 %vm3802_vm0, %v3801_v0 }
 0x70c   : > { %v1662_v40 = vpop.xlane.xlu1 %1661 }
 0x70d   : > { %v1664_v41 = vmul.f32 0.03125, %v1662_v40 }
 0x70f   : > { %v1665_v42 = vsub.f32 %v1659_v37, %v1664_v41 }
 0x711   : > { %v1666_v43 = vmul.f32 %v1665_v42, %v1665_v42 }
 0x713   : > { %v1667_v44 = vsel %vm816_vm1, %v1666_v43, 0.0 }
 0x714   : > { %1668 = vadd.xlane.f32.xlu0 %v1667_v44 }
 0x743   : > { %v3280_v4 = vpop.f32.mrf.mxu0 }
 0x744   : > { %v4335_v7 = vadd.f32 %v3280_v4, %v3087_v6 }
 0x745   : > { %v1852_v8 = vpop.f32.mrf.mxu0 }
 0x746   : > { %v4337_v9 = vadd.f32 %v3087_v6, %v1852_v8  ;;  %1877 = vrot.lane.b32.xlu0 %v4335_v7, %s3804_s30 }
 0x748   : > { %1875 = vrot.lane.b32.xlu1 %v4337_v9, %s3804_s30 }
 0x74c   : > { %1881 = vrot.lane.b32.xlu1 %v4335_v7, %s3806_s1 }
 0x750   : > { %1885 = vrot.lane.b32.xlu1 %v4335_v7, %s3803_s2 }
 0x754   : > { %1883 = vrot.lane.b32.xlu1 %v4337_v9, %s3803_s2 }
 0x79d   : > { %v1669_v53 = vpop.xlane.xlu0 %1668 }
 0x79e   : > { %v1670_v54 = vmul.f32 0.03125, %v1669_v53 }
 0x7a0   : > { %v1671_v55 = vadd.f32 1e-05, %v1670_v54 }
 0x7a2   : > { %3504 = vrsqrt.f32 %v1671_v55 }
 0x7af   : > { %v3505_v62 = vpop.eup %3504 }
 0x7b0   : > { %v1673_v63 = vmul.f32 %v3505_v62, %v1665_v42 }
 0x7b2   : > { %v1678_v2 = vmul.f32 %v1677_v61, %v1673_v63 }
 0x7b4   : > { %v4326_v3 = vadd.f32 %v1682_v1, %v1678_v2 }
 0x7b6   : > { %3268 = vmatmul.mubr.msk.f32.vlgmr.msra.gmra.mxu1 %vm816_vm1, %v4326_v3 }
 0x7b7   : > { %3285 = vmatprep.mubr.msk.f32.mxu1 %vm3802_vm0, %v3801_v0  ;;  %3282 = vmatpush3.xpose.msk.msra.mxu1 %vm912_vm2, %v4335_v7 }
 0x7b8   : > { %3283 = vmatprep.subr.mxu1 %v3801_v0  ;;  %v1878_v10 = vpop.permute.xlu0 %1877 }
 0x7b9   : > { %3289 = vmatpush3.xpose.msk.msra.mxu0 %vm912_vm2, %v1878_v10 }
 0x7ba   : > { %3290 = vmatprep.subr.mxu0 %v3801_v0  ;;  %v1876_v11 = vpop.permute.xlu1 %1875 }
 0x7bb   : > { %3284 = vmatpush3.xpose.msk.msra.mxu1 %vm912_vm2, %v4337_v9 }
 0x7bc   : > { %3295 = vmatprep.subr.mxu1 %v3801_v0 }
 0x7bd   : > { %3291 = vmatpush3.xpose.msk.msra.mxu0 %vm912_vm2, %v1876_v11 }
 0x7be   : > { %3302 = vmatprep.subr.mxu0 %v3801_v0  ;;  %v1882_v17 = vpop.permute.xlu1 %1881 }
 0x7c2   : > { %v1886_v18 = vpop.permute.xlu1 %1885 }
 0x7c6   : > { %v4377_v20 = vpop.permute.xlu1 %1883 }
 0x876   : > { %v1764_v13 = vpop.f32.mrf.mxu1 }
 0x877   : > { %v1765_v14 = vadd.f32 %v3085_v12, %v1764_v13 }
 0x878   : > { %v3269_v15 = vpop.f32.mrf.mxu1 }
 0x879   : > { %v1768_v16 = vmul.f32 0.35355338, %v1765_v14 }
 0x87b   : > { %1871 = vrot.lane.b32.xlu1 %v1768_v16, %s3803_s2  ;;  %1867 = vrot.lane.b32.xlu0 %v1768_v16, %s3804_s30  ;;  %s4642_s30 = sld [smem:[#allocation35_spill]]  ;;  %s3812_s2 = smov [#allocation14]  }
 0x87c   : > { %3286 = vmatmul.mubr.msk.f32.vlgmr.msra.gmra.mxu1 %vm912_vm2, %v1768_v16 }
 0x87d   : > { %3296 = vmatpush3.xpose.msk.msra.mxu1 %vm912_vm2, %v1882_v17  ;;  %3299 = vmatprep.mubr.msk.f32.mxu1 %vm3802_vm0, %v3801_v0 }
 0x87e   : > { %3297 = vmatprep.subr.mxu1 %v3801_v0 }
 0x87f   : > { %1879 = vrot.lane.b32.xlu0 %v4337_v9, %s3806_s1 }
 0x883   : > { %1869 = vrot.lane.b32.xlu0 %v1768_v16, %s3806_s1  ;;  %s4644_s1 = sld [smem:[#allocation37_spill]] }
 0x8ed   : > { %v1868_v19 = vpop.permute.xlu0 %1867  ;;  %v1872_v23 = vpop.permute.xlu1 %1871 }
 0x8ee   : > { %3293 = vmatmul.mubr.msk.f32.vlgmr.msra.gmra.mxu0 %vm912_vm2, %v1868_v19 }
 0x8ef   : > { %3303 = vmatpush3.xpose.msk.msra.mxu0 %vm912_vm2, %v1886_v18  ;;  %3306 = vmatprep.mubr.msk.f32.mxu0 %vm3802_vm0, %v3801_v0 }
 0x8f0   : > { %3304 = vmatprep.subr.mxu0 %v3801_v0 }
 0x8f1   : > { %v4379_v21 = vpop.permute.xlu0 %1879 }
 0x8f2   : > { %3298 = vmatpush3.xpose.msk.msra.mxu1 %vm912_vm2, %v4379_v21 }
 0x8f3   : > { %3305 = vmatpush3.xpose.msk.msra.mxu0 %vm912_vm2, %v4377_v20  ;;  %3309 = vmatprep.subr.mxu1 %v3801_v0 }
 0x8f4   : > { %3323 = vmatprep.subr.mxu0 %v3801_v0 }
 0x8f5   : > { %v1870_v24 = vpop.permute.xlu0 %1869 }
 0x8f6   : > { %3307 = vmatmul.mubr.msk.f32.vlgmr.msra.gmra.mxu0 %vm912_vm2, %v1872_v23  ;;  %3300 = vmatmul.mubr.msk.f32.vlgmr.msra.gmra.mxu1 %vm912_vm2, %v1870_v24 }
 0x8f7   : > { %3313 = vmatprep.mubr.msk.f32.mxu1 %vm3802_vm0, %v3801_v0  ;;  %3327 = vmatprep.mubr.msk.f32.mxu0 %vm3802_vm0, %v3801_v0 }
 0x93c   : > { %v1959_v27 = vpop.f32.mrf.mxu1 }
 0x93d   : > { %v1960_v28 = vadd.f32 %v1959_v27, %v804_v26  ;;  %v1863_v27 = vld [vmem:[#allocation11 + $0x10] sm:$0xff] }
 0x93e   : > { %v3287_v29 = vpop.f32.mrf.mxu1 }
 0x93f   : > { %v2191_v30 = vsel %vm1576_vm4, %v1960_v28, -inf }
 0x940   : > { %2192 = vmax.xlane.f32.xlu0 %v2191_v30  ;;  %v1861_v30 = vld [vmem:[#allocation11] sm:$0xff] }
 0x9ae   : > { %v2035_v31 = vpop.f32.mrf.mxu0 }
 0x9af   : > { %v2036_v32 = vadd.f32 %v2035_v31, %v804_v26 }
 0x9b0   : > { %v3294_v33 = vpop.f32.mrf.mxu0 }
 0x9b1   : > { %v2194_v34 = vsel %vm1576_vm4, %v2036_v32, -inf }
 0x9b2   : > { %2195 = vmax.xlane.f32.xlu1 %v2194_v34 }
 0x9b6   : > { %v2187_v35 = vpop.f32.mrf.mxu0  ;;  %v2111_v36 = vpop.f32.mrf.mxu1 }
 0x9b7   : > { %v2112_v37 = vadd.f32 %v2111_v36, %v804_v26  ;;  %v2188_v40 = vadd.f32 %v2187_v35, %v804_v26  ;;  %v1864_v26 = vld [vmem:[#allocation11 + $0x18] sm:$0xff] }
 0x9b8   : > { %v3308_v38 = vpop.f32.mrf.mxu0  ;;  %v3301_v39 = vpop.f32.mrf.mxu1 }
 0x9b9   : > { %v2197_v22 = vsel %vm1576_vm4, %v2112_v37, -inf  ;;  %v2200_v41 = vsel %vm1576_vm4, %v2188_v40, -inf }
 0x9ba   : > { %2198 = vmax.xlane.f32.xlu0 %v2197_v22 }
 0x9be   : > { %2201 = vmax.xlane.f32.xlu0 %v2200_v41  ;;  %v3106_v41 = vld [vmem:[%s4642_s30] ss:$0 sm:$0xff]  ;;  %s3718_s30 = sshll.u32 %s3812_s2, 4  ;;  %s3719_s30 = int_to_ptr.vmem [resolvable:$false] %s3718_s30 }
 0x9bf   : > { %s3720_s3 = scalar_lea.vmem %s3719_s30, 256  ;;  %p3721_p0 = scmp.lt.s32.totalorder %s2883_s8, %s3719_s30 }
 0x9c0   : > { %p3722_p4 = scmp.lt.s32.totalorder %s3720_s3, %s3714_s21 }
 0x9c2   : > { %p3723_p7 = por %p3722_p4, %p3721_p0 }
 0x9c3   : > { %2237 = vrot.lane.b32.xlu1 %v4335_v7, %s3805_s28 }
 0x9c4   : > { %p3724_p3 = pnand %p3723_p7, %p3717_p11 }
 0x9c7   : > { %2316 = vrot.lane.b32.xlu1 %v1878_v10, %s3805_s28 }
 0x9c9   : > { %v2193_v42 = vpop.xlane.xlu0 %2192 }
 0x9ca   : > { %v2203_v43 = vsub.f32 %v1960_v28, %v2193_v42  ;;  %v1862_v28 = vld [vmem:[#allocation11 + $0x8] sm:$0xff] }
 0x9cb   : > { %2314 = vrot.lane.b32.xlu1 %v1876_v11, %s3805_s28 }
 0x9cc   : > { %v2207_v44 = vmul.f32 1.442695, %v2203_v43 }
 0x9ce   : > { %3506 = vpow2.f32 %v2207_v44 }
 0x9cf   : > { %2474 = vrot.lane.b32.xlu1 %v1886_v18, %s3805_s28 }
 0x9d4   : > { %2235 = vrot.lane.b32.xlu0 %v4337_v9, %s3805_s28 }
 0x9d8   : > { %2395 = vrot.lane.b32.xlu0 %v1882_v17, %s3805_s28 }
 0x9db   : > { %v3507_v45 = vpop.eup %3506 }
 0x9dc   : > { %v2215_v46 = vsel %vm1576_vm4, %v3507_v45, 0.0 }
 0x9f3   : > { %2216 = vadd.xlane.f32.xlu1 %v2215_v46 }
 0xa3b   : > { %v2196_v5 = vpop.xlane.xlu1 %2195 }
 0xa3c   : > { %v2204_v47 = vsub.f32 %v2036_v32, %v2196_v5 }
 0xa3e   : > { %v2209_v48 = vmul.f32 1.442695, %v2204_v47 }
 0xa3f   : > { %v2238_v49 = vpop.permute.xlu1 %2237 }
 0xa40   : > { %3508 = vpow2.f32 %v2209_v48  ;;  %3310 = vmatpush3.msra.mxu1 %v2238_v49 }
 0xa41   : > { %3311 = vmatprep.subr.mxu1 %v3801_v0 }
 0xa43   : > { %v2199_v50 = vpop.xlane.xlu0 %2198  ;;  %v2317_v6 = vpop.permute.xlu1 %2316 }
 0xa44   : > { %v2205_v51 = vsub.f32 %v2112_v37, %v2199_v50 }
 0xa46   : > { %v2211_v52 = vmul.f32 1.442695, %v2205_v51  ;;  %v2672_v51 = vld [vmem:[#allocation13 + $0x18] sm:$0xff] }
 0xa47   : > { %v2202_v53 = vpop.xlane.xlu0 %2201  ;;  %v2315_v7 = vpop.permute.xlu1 %2314 }
 0xa48   : > { %3510 = vpow2.f32 %v2211_v52  ;;  %v2206_v54 = vsub.f32 %v2188_v40, %v2202_v53  ;;  %v2671_v52 = vld [vmem:[#allocation13 + $0x10] sm:$0xff]  ;;  %v2670_v53 = vld [vmem:[#allocation13 + $0x8] sm:$0xff] }
 0xa4a   : > { %v2213_v55 = vmul.f32 1.442695, %v2206_v54 }
 0xa4b   : > { %v2236_v56 = vpop.permute.xlu0 %2235  ;;  %v2475_v8 = vpop.permute.xlu1 %2474 }
 0xa4c   : > { %3512 = vpow2.f32 %v2213_v55  ;;  %3312 = vmatpush3.msra.mxu1 %v2236_v56 }
 0xa4d   : > { %v3509_v58 = vpop.eup %3508  ;;  %3316 = vmatprep.subr.mxu1 %v3801_v0 }
 0xa4e   : > { %v2218_v61 = vsel %vm1576_vm4, %v3509_v58, 0.0 }
 0xa4f   : > { %2219 = vadd.xlane.f32.xlu0 %v2218_v61  ;;  %v2396_v62 = vpop.permute.xlu0 %2395 }
 0xa50   : > { %3324 = vmatpush3.msra.mxu0 %v2396_v62 }
 0xa51   : > { %3325 = vmatprep.subr.mxu0 %v3801_v0 }
 0xa55   : > { %v3511_v63 = vpop.eup %3510 }
 0xa56   : > { %v2221_v1 = vsel %vm1576_vm4, %v3511_v63, 0.0 }
 0xa57   : > { %2222 = vadd.xlane.f32.xlu1 %v2221_v1 }
 0xa59   : > { %v3513_v2 = vpop.eup %3512 }
 0xa5a   : > { %v2224_v4 = vsel %vm1576_vm4, %v3513_v2, 0.0 }
 0xa5b   : > { %2225 = vadd.xlane.f32.xlu0 %v2224_v4 }
 0xa68   : > { %2472 = vrot.lane.b32.xlu1 %v4377_v20, %s3805_s28 }
 0xa71   : > { %2393 = vrot.lane.b32.xlu0 %v4379_v21, %s3805_s28 }
 0xa7c   : > { %v2217_v9 = vpop.xlane.xlu1 %2216 }
 0xa7d   : > { %3514 = vrcp.f32 %v2217_v9 }
 0xa8a   : > { %v3515_v10 = vpop.eup %3514 }
 0xa8b   : > { %v2231_v11 = vmul.f32 %v3515_v10, %v3507_v45 }
 0xa8d   : > { %3314 = vmatmul.mubr.msk.f32.vlgmr.msra.gmra.mxu1 %vm1576_vm4, %v2231_v11 }
 0xa8e   : > { %3317 = vmatpush3.msra.mxu1 %v2317_v6  ;;  %3320 = vmatprep.mubr.msk.f32.mxu1 %vm3802_vm0, %v3801_v0 }
 0xa8f   : > { %3318 = vmatprep.subr.mxu1 %v3801_v0 }
 0xa90   : > { %3319 = vmatpush3.msra.mxu1 %v2315_v7 }
 0xa91   : > { %3330 = vmatprep.subr.mxu1 %v3801_v0 }
 0xad8   : > { %v2220_v12 = vpop.xlane.xlu0 %2219 }
 0xad9   : > { %3516 = vrcp.f32 %v2220_v12 }
 0xae0   : > { %v2223_v13 = vpop.xlane.xlu1 %2222 }
 0xae1   : > { %3518 = vrcp.f32 %v2223_v13 }
 0xae4   : > { %v2226_v14 = vpop.xlane.xlu0 %2225  ;;  %v2473_v18 = vpop.permute.xlu1 %2472 }
 0xae5   : > { %3520 = vrcp.f32 %v2226_v14  ;;  %v3108_v14 = vld [vmem:[%s4644_s1] ss:$0 sm:$0xff] }
 0xae6   : > { %v3517_v15 = vpop.eup %3516 }
 0xae7   : > { %v2232_v16 = vmul.f32 %v3517_v15, %v3509_v58 }
 0xae8   : > { %v2394_v17 = vpop.permute.xlu0 %2393 }
 0xae9   : > { %3321 = vmatmul.mubr.msk.f32.vlgmr.msra.gmra.mxu1 %vm1576_vm4, %v2232_v16  ;;  %3326 = vmatpush3.msra.mxu0 %v2394_v17 }
 0xaea   : > { %3331 = vmatpush3.msra.mxu1 %v2475_v8  ;;  %3334 = vmatprep.mubr.msk.f32.mxu1 %vm3802_vm0, %v3801_v0 }
 0xaeb   : > { %3332 = vmatprep.subr.mxu1 %v3801_v0  ;;  %3337 = vmatprep.subr.mxu0 %v3801_v0 }
 0xaec   : > { %3333 = vmatpush3.msra.mxu1 %v2473_v18 }
 0xaed   : > { %3348 = vmatprep.subr.mxu1 %v3801_v0 }
 0xaee   : > { %v3519_v19 = vpop.eup %3518 }
 0xaef   : > { %v2233_v20 = vmul.f32 %v3519_v19, %v3511_v63  ;;  %v3110_v19 = vld [vmem:[%s4645_s12] ss:$0 sm:$0xff] }
 0xaf1   : > { %3328 = vmatmul.mubr.msk.f32.vlgmr.msra.gmra.mxu0 %vm1576_vm4, %v2233_v20 }
 0xaf2   : > { %v3521_v21 = vpop.eup %3520  ;;  %3345 = vmatprep.mubr.msk.f32.mxu0 %vm3802_vm0, %v3801_v0  ;;  %3338 = vmatpush3.msra.mxu0 %v1864_v26 }
 0xaf3   : > { %v2234_v23 = vmul.f32 %v3521_v21, %v3513_v2  ;;  %3339 = vmatprep.subr.mxu0 %v3801_v0  ;;  %v2661_v2 = vsub.s32 1, %v4311_v57 }
 0xaf4   : > { %3340 = vmatpush3.msra.mxu0 %v1863_v27 }
 0xaf5   : > { %3335 = vmatmul.mubr.msk.f32.vlgmr.msra.gmra.mxu1 %vm1576_vm4, %v2234_v23  ;;  %3341 = vmatprep.subr.mxu0 %v3801_v0  ;;  %v2662_v4 = vrot.slane %v4317_v59, %v2661_v2  ;;  %v2667_v8 = vrot.slane %v4322_v60, %v2661_v2 }
 0xaf6   : > { %3356 = vmatprep.mubr.msk.f32.mxu1 %vm3802_vm0, %v3801_v0  ;;  %3342 = vmatpush3.msra.mxu0 %v1862_v28 }
 0xaf7   : > { %3343 = vmatprep.subr.mxu0 %v3801_v0  ;;  %3349 = vmatpush3.msra.mxu1 %v2672_v51 }
 0xaf8   : > { %3344 = vmatpush3.msra.mxu0 %v1861_v30  ;;  %3350 = vmatprep.subr.mxu1 %v3801_v0 }
 0xaf9   : > { %3359 = vmatprep.subr.mxu0 %v3801_v0  ;;  %3351 = vmatpush3.msra.mxu1 %v2671_v52 }
 0xafa   : > { %3352 = vmatprep.subr.mxu1 %v3801_v0 }
 0xafb   : > { %3353 = vmatpush3.msra.mxu1 %v2670_v53 }
 0xafc   : > { %3354 = vmatprep.subr.mxu1 %v3801_v0 }
 0xb4d   : > { %v2310_v24 = vpop.f32.mrf.mxu1 }
 0xb4f   : > { %v3315_v25 = vpop.f32.mrf.mxu1 }
 0xba9   : > { %v2389_v29 = vpop.f32.mrf.mxu1 }
 0xbaa   : > { %2552 = vrot.lane.b32.xlu0 %v2389_v29, %s3809_s4  ;;  %s4643_s4 = sld [smem:[#allocation38_spill]] }
 0xbab   : > { %v3322_v31 = vpop.f32.mrf.mxu1 }
 0xbb0   : > { %v2761_v54 = vld [vmem:[%s4643_s4 + $0x38] sm:$0xff]  ;;  %v2760_v55 = vld [vmem:[%s4643_s4 + $0x30] sm:$0xff]  ;;  %v2759_v56 = vld [vmem:[%s4643_s4 + $0x28] sm:$0xff] }
 0xbb1   : > { %v2468_v32 = vpop.f32.mrf.mxu0  ;;  %v2758_v58 = vld [vmem:[%s4643_s4 + $0x20] sm:$0xff]  ;;  %v2757_v61 = vld [vmem:[%s4643_s4 + $0x18] sm:$0xff]  ;;  %v2756_v11 = vld [vmem:[%s4643_s4 + $0x10] sm:$0xff] }
 0xbb2   : > { %2556 = vrot.lane.b32.xlu1 %v2468_v32, %s3810_s25  ;;  %v2755_v12 = vld [vmem:[%s4643_s4 + $0x8] sm:$0xff]  ;;  %v2754_v13 = vld [vmem:[%s4643_s4] sm:$0xff] }
 0xbb3   : > { %v3329_v33 = vpop.f32.mrf.mxu0 }
 0xbb4   : > { %v2859_v33 = vsub.s32 2, %v4311_v57 }
 0xbb5   : > { %v2547_v34 = vpop.f32.mrf.mxu1 }
 0xbb6   : > { %2560 = vrot.lane.b32.xlu0 %v2547_v34, %s3811_s10  ;;  %v2860_v34 = vrot.slane %v4317_v59, %v2859_v33 }
 0xbb7   : > { %v3336_v35 = vpop.f32.mrf.mxu1 }
 0xc1c   : > { %v2553_v36 = vpop.permute.xlu0 %2552 }
 0xc1d   : > { %v2563_v38 = vsel %vm912_vm2, %v2310_v24, %v2553_v36 }
 0xc24   : > { %v2557_v37 = vpop.permute.xlu1 %2556 }
 0xc25   : > { %v2564_v39 = vsel %vm1576_vm4, %v2563_v38, %v2557_v37  ;;  %v2865_v37 = vrot.slane %v4322_v60, %v2859_v33 }
 0xc28   : > { %v2561_v40 = vpop.permute.xlu0 %2560 }
 0xc29   : > { %v2565_v22 = vsel %vm1578_vm5, %v2564_v39, %v2561_v40 }
 0xc2a   : > { %3346 = vmatmul.mubr.msk.f32.vlgmr.msra.gmra.mxu0 %vm816_vm1, %v2565_v22 }
 0xc2b   : > { %3375 = vmatprep.mubr.msk.f32.mxu0 %vm3802_vm0, %v3801_v0  ;;  %3360 = vmatpush3.msra.mxu0 %v2761_v54 }
 0xc2c   : > { %3361 = vmatprep.subr.mxu0 %v3801_v0 }
 0xc2d   : > { %3362 = vmatpush3.msra.mxu0 %v2760_v55 }
 0xc2e   : > { %3363 = vmatprep.subr.mxu0 %v3801_v0 }
 0xc2f   : > { %3364 = vmatpush3.msra.mxu0 %v2759_v56 }
 0xc30   : > { %3365 = vmatprep.subr.mxu0 %v3801_v0 }
 0xc31   : > { %3366 = vmatpush3.msra.mxu0 %v2758_v58 }
 0xc32   : > { %3367 = vmatprep.subr.mxu0 %v3801_v0 }
 0xc33   : > { %3368 = vmatpush3.msra.mxu0 %v2757_v61 }
 0xc34   : > { %3369 = vmatprep.subr.mxu0 %v3801_v0 }
 0xc35   : > { %3370 = vmatpush3.msra.mxu0 %v2756_v11 }
 0xc36   : > { %3371 = vmatprep.subr.mxu0 %v3801_v0 }
 0xc37   : > { %3372 = vmatpush3.msra.mxu0 %v2755_v12 }
 0xc38   : > { %3373 = vmatprep.subr.mxu0 %v3801_v0 }
 0xc39   : > { %3374 = vmatpush3.msra.mxu0 %v2754_v13 }
 0xcea   : > { %v2641_v42 = vpop.f32.mrf.mxu0 }
 0xceb   : > { %v2642_v43 = vadd.f32 %v3106_v41, %v2641_v42 }
 0xcec   : > { %v3347_v44 = vpop.f32.mrf.mxu0 }
 0xced   : > { %v2645_v45 = vadd.f32 %v2642_v43, %v4326_v3  ;;  %v2669_v3 = vld [vmem:[#allocation13] sm:$0xff] }
 0xcee   : > { %3355 = vmatpush3.msra.mxu1 %v2669_v3 }
 0xcef   : > { %v2646_v46 = vsel %vm816_vm1, %v2645_v45, 0.0 }
 0xcf0   : > { %2647 = vadd.xlane.f32.xlu1 %v2646_v46 }
 0xd79   : > { %v2648_v5 = vpop.xlane.xlu1 %2647 }
 0xd7a   : > { %v2649_v47 = vmul.f32 0.03125, %v2648_v5 }
 0xd7c   : > { %v2650_v48 = vsub.f32 %v2645_v45, %v2649_v47 }
 0xd7e   : > { %v2651_v49 = vmul.f32 %v2650_v48, %v2650_v48 }
 0xd80   : > { %v2652_v50 = vsel %vm816_vm1, %v2651_v49, 0.0 }
 0xd81   : > { %2653 = vadd.xlane.f32.xlu0 %v2652_v50 }
 0xe0a   : > { %v2654_v62 = vpop.xlane.xlu0 %2653 }
 0xe0b   : > { %v2655_v63 = vmul.f32 0.03125, %v2654_v62 }
 0xe0d   : > { %v2656_v1 = vadd.f32 1e-05, %v2655_v63 }
 0xe0f   : > { %3522 = vrsqrt.f32 %v2656_v1 }
 0xe1c   : > { %v3523_v6 = vpop.eup %3522 }
 0xe1d   : > { %v2658_v7 = vmul.f32 %v3523_v6, %v2650_v48 }
 0xe1f   : > { %v2663_v9 = vmul.f32 %v2662_v4, %v2658_v7 }
 0xe21   : > { %v2668_v10 = vadd.f32 %v2667_v8, %v2663_v9 }
 0xe23   : > { %3357 = vmatmul.mubr.msk.f32.vlgmr.msra.gmra.mxu1 %vm816_vm1, %v2668_v10 }
 0xee3   : > { %v2749_v15 = vpop.f32.mrf.mxu1 }
 0xee4   : > { %v2750_v16 = vadd.f32 %v3108_v14, %v2749_v15 }
 0xee5   : > { %v3358_v17 = vpop.f32.mrf.mxu1 }
 0xee6   : > { %v2753_v18 = vmax.f32 %v2750_v16, 0.0 }
 0xee8   : > { %3376 = vmatmul.mubr.msk.f32.vlgmr.msra.gmra.mxu0 %vm2769_vm7, %v2753_v18 }
 0xfa8   : > { %v2839_v20 = vpop.f32.mrf.mxu0 }
 0xfa9   : > { %v2840_v21 = vadd.f32 %v3110_v19, %v2839_v20 }
 0xfaa   : > { %v3377_v23 = vpop.f32.mrf.mxu0 }
 0xfab   : > { %v2843_v24 = vadd.f32 %v2840_v21, %v2668_v10 }
 0xfad   : > { %v2844_v0 = vsel %vm816_vm1, %v2843_v24, 0.0 }
 0xfae   : > { %2845 = vadd.xlane.f32.xlu0 %v2844_v0 }
0x1037   : > { %v2846_v25 = vpop.xlane.xlu0 %2845 }
0x1038   : > { %v2847_v26 = vmul.f32 0.03125, %v2846_v25 }
0x103a   : > { %v2848_v27 = vsub.f32 %v2843_v24, %v2847_v26 }
0x103c   : > { %v2849_v28 = vmul.f32 %v2848_v27, %v2848_v27 }
0x103e   : > { %v2850_v29 = vsel %vm816_vm1, %v2849_v28, 0.0 }
0x103f   : > { %2851 = vadd.xlane.f32.xlu1 %v2850_v29 }
0x10c8   : > { %v2852_v30 = vpop.xlane.xlu1 %2851 }
0x10c9   : > { %v2853_v31 = vmul.f32 0.03125, %v2852_v30 }
0x10cb   : > { %v2854_v32 = vadd.f32 1e-05, %v2853_v31 }
0x10cd   : > { %3524 = vrsqrt.f32 %v2854_v32 }
0x10da   : > { %v3525_v35 = vpop.eup %3524 }
0x10db   : > { %v2856_v36 = vmul.f32 %v3525_v35, %v2848_v27 }
0x10dd   : > { %v2861_v38 = vmul.f32 %v2860_v34, %v2856_v36 }
0x10df   : > { %v2866_v39 = vadd.f32 %v2865_v37, %v2861_v38 }
0x10e1   : > { %2867 = vst.msk [vmem:[%s788_s0] sm:$0xff] %vm816_vm1, %v2866_v39 }
0x10e2   : > { %3727 = shalt.err (!%p3724_p3)
}
0x10e3   : > { %s3728_s24 = scalar_lea.hbm %s2880_s17, 128  ;;  %s3732_s1 = scalar_lea.hbm %s4647_s29, 256 }
0x10e4   : > { %p3729_p12 = scmp.ne.s32.totalorder %s2880_s17, %s3728_s24  ;;  %p3733_p9 = scmp.lt.s32.totalorder %s2880_s17, %s4647_s29 }
0x10e5   : > { %p3734_p2 = scmp.lt.s32.totalorder %s3732_s1, %s3728_s24 }
0x10e6   : > { %p3730_p13 = pnand %p3729_p12, %p4648_p8 }
0x10e7   : > { %p3735_p5 = por %p3734_p2, %p3733_p9 }
0x10e8   : > { %p3731_p6 = pneg %p3730_p13 }
0x10ea   : > { %p3736_p1 = pnand %p3735_p5, %p3731_p6 }
0x10ec   : > { %3739 = shalt.err (!%p3736_p1)
}
0x10ed   : > { %3400 = dma.vmem_to_hbm [thread:$0]  (%p4648_p8), %s2883_s8, 128, %s2880_s17, %s2869_s20  }
0x10ee PF: > { %s4649_s12 = sld [smem:[#allocation20_spill]] }
0x10ef   : > { %s4650_s27 = sld [smem:[#allocation25_spill]] }
0x10f0   : > { %s4651_s0 = sld [smem:[#allocation21_spill]] }
0x10f4   : > { %s2894_s15 = sand.u32 1, %s4649_s12  }
0x10f5   : > { %p4652_p10 = scmp.ne.s32.totalorder %s4650_s27, 0  ;;  %s2895_s26 = scalar_lea.sflag [#allocation4], %s2894_s15 }
0x10f6   : > { %p4653_p11 = scmp.ge.s32.totalorder %s4651_s0, 2 }
0x10f8   : > { %p3426_p0 = pnand %p4653_p11, %p4652_p10 }
0x10fa   : > { %p3427_p4 = pneg %p3426_p0 }
0x10fc   : > { %3773 = dma.done.wait (%p3427_p4), %s2895_s26, 128  }
0x10fd   : > { %3775 = vsyncadd (%p3427_p4), %s2895_s26, 4294967168  ;;  %s4654_s24 = sld [smem:[#allocation22_spill]]  ;;  %s4656_s1 = smov %s3782_s22 }
0x10fe   : > { %s4655_s21 = sld [smem:[#allocation23_spill]]  ;;  %s4657_s22 = smov %s3786_s23 }
0x1103   : > { %p38_p7 = scmp.ge.s32.totalorder %s4654_s24, 4  }
0x1104   : > { %s4658_s23 = smov %s4655_s21 }
0x1105   :  { %40 = sbr.rel (!%p38_p7) target bundleno = 25 (0x19), region = 188 }
0x110a   :  { %2900 = vsyncpa [#allocation3], 1 }
0x110b   :  { %2902 = vsyncpa [#allocation3 + $0x1], 1 }
0x110c   :  { %2903 = vsyncpa [#allocation6], 1 }
0x110d   :  { %2905 = vsyncpa [#allocation6 + $0x1], 1 }
0x110e   :  { %2906 = vsyncpa [#allocation9], 1 }
0x110f   :  { %2907 = vsyncpa [#allocation12], 1 }
0x1110   :  { %2908 = vsyncpa [#allocation4], 1 }
0x1111   :  { %2910 = vsyncpa [#allocation4 + $0x1], 1 }

</bundles_post_ra>
